<compile_context>
chip_gen: v7x
topology: tpu7x:2x2x1
jax: 0.10.0
libtpu: 0.0.40
codegen_flags: <defaults>
</compile_context>

<pallas_src>
import functools

import jax
import jax.numpy as jnp
from jax.experimental import pallas as pl
from jax.experimental.pallas import tpu as pltpu


def _round_up(v, m):
    return (v + m - 1) // m * m


def _vmem_limit_bytes():
    # ~15% headroom below physical VMEM (~109 MiB v5e/v6e, ~54 MiB v7x).
    try:
        cap = pltpu.get_tpu_info().vmem_capacity_bytes
    except Exception:
        cap = 64 * 1024 * 1024
    return int(cap * 0.85)


def _fused_gat_kernel(x_ref, w1_ref, b1_ref, w2_ref, b2_ref, adj_ref, out_ref,
                      *, heads, hid, num_classes):
    f32 = jnp.float32
    bf16 = jnp.bfloat16
    h1c1 = heads * hid

    adj = adj_ref[...]                        # [Np, Np] bf16 (target, source) mask
    x = x_ref[...].astype(bf16)               # [Np, Fp]
    w1 = w1_ref[...].astype(bf16)             # [Fp, C1p] = [w1 | w1@a1_dst | w1@a1_src | 0]
    b1 = b1_ref[...]                          # [1, H*hid] f32
    w2 = w2_ref[...].astype(bf16)             # [H*hid, Cp] = [w2 | 0 | w2@a2_dst | w2@a2_src]
    b2 = b2_ref[...]                          # [1, Cp] f32
    cp = w2.shape[1]

    def leaky(v):
        return jnp.where(v > 0, v, 0.2 * v)

    # ---------------- conv1: heads=H, concat=True ----------------------------
    xw1f = jnp.dot(x, w1, preferred_element_type=f32)          # [Np, C1p]
    a1d = xw1f[:, h1c1:h1c1 + heads]                            # [Np, H] target term
    a1s = xw1f[:, h1c1 + heads:h1c1 + 2 * heads]                # [Np, H] source term
    a1s_t = jnp.transpose(a1s)                                  # [H, Np] one XLU transpose
    a1s_max = jnp.max(a1s, axis=0, keepdims=True)               # [1, H]  closed-form max input

    lane1 = jax.lax.broadcasted_iota(jnp.int32, xw1f.shape, 1)
    # aggregation RHS: real xw columns, then a ones column -> denominator for free
    rhs1 = jnp.where(lane1 < h1c1, xw1f,
                     jnp.where(lane1 == h1c1, 1.0, 0.0)).astype(bf16)

    head_outs = []
    for h in range(heads):
        # closed form: max_j e[i,j] = LeakyReLU(a_dst[i] + max_j a_src[j])
        m = leaky(a1d[:, h:h + 1] + a1s_max[:, h:h + 1])        # [Np, 1]
        e = leaky(a1d[:, h:h + 1] + a1s_t[h:h + 1, :])          # [Np, Np]
        p = jnp.exp(e - m).astype(bf16) * adj                   # masked, UNnormalized
        agg = jnp.dot(p, rhs1, preferred_element_type=f32)      # [Np, C1p]
        denom = jnp.maximum(agg[:, h1c1:h1c1 + 1], 1e-12)       # [Np, 1]
        inv = pl.reciprocal(denom, approx=True)
        head_outs.append(agg[:, h * hid:(h + 1) * hid] * inv)   # [Np, hid]

    h1 = head_outs[0] if heads == 1 else jnp.concatenate(head_outs, axis=1)
    h1 = h1 + b1
    # ELU (exp(x)-1 form; expm1 would be marginally more accurate near 0)
    h1 = jnp.where(h1 > 0, h1, jnp.exp(h1) - 1.0)               # [Np, H*hid]

    # ---------------- conv2: 1 head, concat=False (mean over 1 head = id) ----
    xw2f = jnp.dot(h1.astype(bf16), w2, preferred_element_type=f32)   # [Np, Cp]
    a2d = xw2f[:, cp - 2:cp - 1]                                # [Np, 1]
    a2s = xw2f[:, cp - 1:cp]                                    # [Np, 1]
    a2s_t = jnp.transpose(a2s)                                  # [1, Np]
    a2s_max = jnp.max(a2s, axis=0, keepdims=True)               # [1, 1]

    lane2 = jax.lax.broadcasted_iota(jnp.int32, xw2f.shape, 1)
    rhs2 = jnp.where(lane2 < num_classes, xw2f,
                     jnp.where(lane2 == num_classes, 1.0, 0.0)).astype(bf16)

    m2 = leaky(a2d + a2s_max)                                   # [Np, 1]
    e2 = leaky(a2d + a2s_t)                                     # [Np, Np]
    p2 = jnp.exp(e2 - m2).astype(bf16) * adj
    agg2 = jnp.dot(p2, rhs2, preferred_element_type=f32)        # [Np, Cp]
    denom2 = jnp.maximum(agg2[:, num_classes:num_classes + 1], 1e-12)
    logits = agg2 * pl.reciprocal(denom2, approx=True) + b2     # [Np, Cp]

    # ---------------- log_softmax over the first `num_classes` lanes ---------
    valid = lane2 < num_classes
    z = jnp.where(valid, logits, -1e30)
    mz = jnp.max(z, axis=1, keepdims=True)
    lse = mz + jnp.log(jnp.sum(jnp.exp(z - mz), axis=1, keepdims=True))
    # one lane-dense [Np, Cp] store (padded lanes written as 0, sliced away)
    out_ref[...] = jnp.where(valid, logits - lse, 0.0).astype(out_ref.dtype)


def gat_forward(x, adj,
                w1, a1_src, a1_dst, b1,
                w2, a2_src, a2_dst, b2,
                *, heads, hid, num_classes):
    """Fused GAT forward. Layer 2 fixed to 1 head / concat=False (module spec)."""
    N, F = x.shape
    Np = _round_up(N, 16)                 # 16: safe sublane multiple for bf16 adj
    Fp = _round_up(F, 128)
    h1c1 = heads * hid
    C1p = _round_up(h1c1 + 2 * heads + 1, 128)     # xw | a_dst | a_src (+room for ones col)
    Cp = _round_up(num_classes + 3, 128)           # logits | ones col | a_dst | a_src
    f32 = jnp.float32

    def pad2(a, rows, cols):
        return jnp.pad(a, ((0, rows - a.shape[0]), (0, cols - a.shape[1])))

    x_p = pad2(x.astype(f32), Np, Fp)

    # --- layer-1 extended weight: alpha matmul folded into the weight matmul
    #     (exact: (x@w)@A == x@(w@A)).
    w1r = w1.astype(f32).reshape(F, heads, hid)
    w1ad = jnp.einsum("fhc,hc->fh", w1r, a1_dst.astype(f32))   # [F, H]
    w1as = jnp.einsum("fhc,hc->fh", w1r, a1_src.astype(f32))   # [F, H]
    w1e = pad2(jnp.concatenate([w1.astype(f32), w1ad, w1as], axis=1), Fp, C1p)
    b1_p = b1.reshape(1, h1c1).astype(f32)

    # --- layer-2 extended weight: w2 in lanes [0, nc), alpha columns at the end
    w2f = w2.astype(f32)
    w2ad = w2f @ a2_dst.astype(f32).reshape(num_classes, 1)     # [H*hid, 1]
    w2as = w2f @ a2_src.astype(f32).reshape(num_classes, 1)     # [H*hid, 1]
    w2e = jnp.zeros((h1c1, Cp), f32)
    w2e = w2e.at[:, :num_classes].set(w2f)
    w2e = w2e.at[:, Cp - 2].set(w2ad[:, 0])
    w2e = w2e.at[:, Cp - 1].set(w2as[:, 0])
    b2_p = pad2(b2.reshape(1, num_classes).astype(f32), 1, Cp)

    # --- adjacency: add self-loops for every row (PyG GATConv add_self_loops=True
    #     default; also keeps the softmax denominator > 0), ship as bf16 only.
    adj_p = pad2(adj.astype(f32), Np, Np)
    adj_p = jnp.maximum(adj_p, jnp.eye(Np, dtype=f32)).astype(jnp.bfloat16)

    kernel = functools.partial(_fused_gat_kernel, heads=heads, hid=hid,
                               num_classes=num_classes)

    # No grid -> whole arrays resident in VMEM, single-buffered (no pipelining).
    vspec = pl.BlockSpec(memory_space=pltpu.MemorySpace.VMEM)
    out = pl.pallas_call(
        kernel,
        out_shape=jax.ShapeDtypeStruct((Np, Cp), f32),
        in_specs=[vspec] * 6,
        out_specs=vspec,
        compiler_params=pltpu.CompilerParams(
            vmem_limit_bytes=_vmem_limit_bytes()),
    )(x_p, w1e, b1_p, w2e, b2_p, adj_p)
    return out[:N, :num_classes]


# ------------------------- pure-JAX reference -------------------------------
def _ref_gat_conv(x, w, a_src, a_dst, bias, adj, heads, out_ch, concat, activation):
    N = x.shape[0]
    xw = (x @ w).reshape(N, heads, out_ch)
    a_s = jnp.einsum("nhc,hc->nh", xw, a_src)
    a_d = jnp.einsum("nhc,hc->nh", xw, a_dst)
    e = a_d[:, None, :] + a_s[None, :, :]                 # [tgt, src, head]
    e = jnp.where(e > 0, e, 0.2 * e)
    e = jnp.where(adj[:, :, None] > 0, e, -1e30)
    p = jax.nn.softmax(e, axis=1)
    out = jnp.einsum("ijh,jhc->ihc", p, xw)
    out = out.reshape(N, heads * out_ch) if concat else out.mean(axis=1)
    out = out + bias
    if activation == "elu":
        out = jnp.where(out > 0, out, jnp.exp(out) - 1.0)
    elif activation == "log_softmax":
        out = jax.nn.log_softmax(out, axis=1)
    return out


if __name__ == "__main__":
    key = jax.random.PRNGKey(0)
    N = 32               # number of nodes
    num_features = 16    # dataset.num_features
    num_classes = 4      # dataset.num_classes
    hid, in_head, out_head = 8, 8, 1

    ks = jax.random.split(key, 10)
    x = jax.random.normal(ks[0], (N, num_features), jnp.float32)

    # deterministic random graph (edge_index equivalent), plus self loops
    num_edges = 96
    src = jax.random.randint(ks[1], (num_edges,), 0, N)
    dst = jax.random.randint(ks[2], (num_edges,), 0, N)
    adj = jnp.zeros((N, N), jnp.float32).at[dst, src].set(1.0)
    adj = jnp.maximum(adj, jnp.eye(N, dtype=jnp.float32))

    # conv1 params: GATConv(num_features -> hid, heads=8, concat=True)
    w1 = 0.1 * jax.random.normal(ks[3], (num_features, in_head * hid), jnp.float32)
    a1_src = 0.1 * jax.random.normal(ks[4], (in_head, hid), jnp.float32)
    a1_dst = 0.1 * jax.random.normal(ks[5], (in_head, hid), jnp.float32)
    b1 = 0.1 * jax.random.normal(ks[6], (1, in_head * hid), jnp.float32)

    # conv2 params: GATConv(hid*heads -> num_classes, heads=1, concat=False)
    w2 = 0.1 * jax.random.normal(ks[7], (in_head * hid, out_head * num_classes), jnp.float32)
    a2_src = 0.1 * jax.random.normal(ks[8], (out_head, num_classes), jnp.float32)
    a2_dst = 0.1 * jax.random.normal(ks[9], (out_head, num_classes), jnp.float32)
    b2 = jnp.zeros((1, num_classes), jnp.float32)

    # fused forward: dropout(eval) -> conv1 -> ELU -> dropout(eval) -> conv2 -> log_softmax
    out = gat_forward(x, adj, w1, a1_src, a1_dst, b1,
                      w2, a2_src, a2_dst, b2,
                      heads=in_head, hid=hid, num_classes=num_classes)
    out = jax.block_until_ready(out)

    # correctness check vs. pure-JAX f32 reference (kernel uses bf16 MXU operands
    # and pl.reciprocal(approx=True) -> loose tolerance; not training-parity grade)
    r1 = _ref_gat_conv(x, w1, a1_src, a1_dst, b1, adj, in_head, hid, True, "elu")
    ref = _ref_gat_conv(r1, w2, a2_src, a2_dst, b2, adj, out_head, num_classes,
                        False, "log_softmax")
    assert out.shape == (N, num_classes)
    assert jnp.allclose(out, ref, atol=3e-2, rtol=3e-2), "mismatch vs reference"

    print("KERNEL_OK")
</pallas_src>

<mosaic_0001>
module attributes {stable_mosaic.version = 11 : i64} {
  func.func @_fused_gat_kernel(%arg0: memref<32x128xf32, #tpu.memory_space<vmem>>, %arg1: memref<128x128xf32, #tpu.memory_space<vmem>>, %arg2: memref<1x64xf32, #tpu.memory_space<vmem>>, %arg3: memref<64x128xf32, #tpu.memory_space<vmem>>, %arg4: memref<1x128xf32, #tpu.memory_space<vmem>>, %arg5: memref<32x32xbf16, #tpu.memory_space<vmem>>, %arg6: memref<32x128xf32, #tpu.memory_space<vmem>>) attributes {dimension_semantics = [], scalar_prefetch = 0 : i64, scratch_operands = 0 : i64, tpu.core_type = #tpu.core_type<tc>} {
    %c0 = arith.constant 0 : index
    %c0_0 = arith.constant 0 : index
    %0 = vector.load %arg5[%c0, %c0_0] : memref<32x32xbf16, #tpu.memory_space<vmem>>, vector<32x32xbf16>
    %c0_1 = arith.constant 0 : index
    %c0_2 = arith.constant 0 : index
    %1 = vector.load %arg0[%c0_1, %c0_2] : memref<32x128xf32, #tpu.memory_space<vmem>>, vector<32x128xf32>
    %2 = arith.truncf %1 : vector<32x128xf32> to vector<32x128xbf16>
    %c0_3 = arith.constant 0 : index
    %c0_4 = arith.constant 0 : index
    %3 = vector.load %arg1[%c0_3, %c0_4] : memref<128x128xf32, #tpu.memory_space<vmem>>, vector<128x128xf32>
    %4 = arith.truncf %3 : vector<128x128xf32> to vector<128x128xbf16>
    %c0_5 = arith.constant 0 : index
    %c0_6 = arith.constant 0 : index
    %5 = vector.load %arg2[%c0_5, %c0_6] : memref<1x64xf32, #tpu.memory_space<vmem>>, vector<1x64xf32>
    %c0_7 = arith.constant 0 : index
    %c0_8 = arith.constant 0 : index
    %6 = vector.load %arg3[%c0_7, %c0_8] : memref<64x128xf32, #tpu.memory_space<vmem>>, vector<64x128xf32>
    %7 = arith.truncf %6 : vector<64x128xf32> to vector<64x128xbf16>
    %c0_9 = arith.constant 0 : index
    %c0_10 = arith.constant 0 : index
    %8 = vector.load %arg4[%c0_9, %c0_10] : memref<1x128xf32, #tpu.memory_space<vmem>>, vector<1x128xf32>
    %cst = arith.constant dense<0.000000e+00> : vector<32x128xf32>
    %9 = tpu.matmul %2, %4, %cst {dimension_numbers = #tpu.dot_dimension_numbers<[1], [0], [0], [1], [0, 0, 1, 1], [], []>} : vector<32x128xbf16>, vector<128x128xbf16>, vector<32x128xf32> -> vector<32x128xf32>
    %10 = vector.extract_strided_slice %9 {offsets = [0, 64], sizes = [32, 8], strides = [1, 1]} : vector<32x128xf32> to vector<32x8xf32>
    %11 = vector.extract_strided_slice %9 {offsets = [0, 72], sizes = [32, 8], strides = [1, 1]} : vector<32x128xf32> to vector<32x8xf32>
    %12 = tpu.transpose %11, [1, 0] : vector<32x8xf32> -> vector<8x32xf32>
    %cst_11 = arith.constant dense<0xFF800000> : vector<8xf32>
    %13 = vector.multi_reduction <maximumf>, %11, %cst_11 [0] : vector<32x8xf32> to vector<8xf32>
    %14 = vector.shape_cast %13 : vector<8xf32> to vector<1x8xf32>
    %15 = tpu.iota {dimensions = array<i32: 1>} : vector<32x128xi32>
    %c64_i32 = arith.constant 64 : i32
    %16 = vector.broadcast %c64_i32 : i32 to vector<32x128xi32>
    %17 = arith.cmpi slt, %15, %16 : vector<32x128xi32>
    %c64_i32_12 = arith.constant 64 : i32
    %18 = vector.broadcast %c64_i32_12 : i32 to vector<32x128xi32>
    %19 = arith.cmpi eq, %15, %18 : vector<32x128xi32>
    %cst_13 = arith.constant 1.000000e+00 : f32
    %cst_14 = arith.constant 0.000000e+00 : f32
    %20 = vector.broadcast %cst_13 : f32 to vector<32x128xf32>
    %21 = vector.broadcast %cst_14 : f32 to vector<32x128xf32>
    %22 = arith.select %19, %20, %21 : vector<32x128xi1>, vector<32x128xf32>
    %23 = arith.select %17, %9, %22 : vector<32x128xi1>, vector<32x128xf32>
    %24 = arith.truncf %23 : vector<32x128xf32> to vector<32x128xbf16>
    %25 = vector.extract_strided_slice %10 {offsets = [0, 0], sizes = [32, 1], strides = [1, 1]} : vector<32x8xf32> to vector<32x1xf32>
    %26 = vector.extract_strided_slice %14 {offsets = [0, 0], sizes = [1, 1], strides = [1, 1]} : vector<1x8xf32> to vector<1x1xf32>
    %27 = vector.broadcast %26 : vector<1x1xf32> to vector<32x1xf32>
    %28 = arith.addf %25, %27 : vector<32x1xf32>
    %cst_15 = arith.constant 0.000000e+00 : f32
    %29 = vector.broadcast %cst_15 : f32 to vector<32x1xf32>
    %30 = arith.cmpf ogt, %28, %29 : vector<32x1xf32>
    %cst_16 = arith.constant 2.000000e-01 : f32
    %31 = vector.broadcast %cst_16 : f32 to vector<32x1xf32>
    %32 = arith.mulf %31, %28 : vector<32x1xf32>
    %33 = arith.select %30, %28, %32 : vector<32x1xi1>, vector<32x1xf32>
    %34 = vector.extract_strided_slice %10 {offsets = [0, 0], sizes = [32, 1], strides = [1, 1]} : vector<32x8xf32> to vector<32x1xf32>
    %35 = vector.extract_strided_slice %12 {offsets = [0, 0], sizes = [1, 32], strides = [1, 1]} : vector<8x32xf32> to vector<1x32xf32>
    %36 = vector.broadcast %34 : vector<32x1xf32> to vector<32x32xf32>
    %37 = vector.broadcast %35 : vector<1x32xf32> to vector<32x32xf32>
    %38 = arith.addf %36, %37 : vector<32x32xf32>
    %cst_17 = arith.constant 0.000000e+00 : f32
    %39 = vector.broadcast %cst_17 : f32 to vector<32x32xf32>
    %40 = arith.cmpf ogt, %38, %39 : vector<32x32xf32>
    %cst_18 = arith.constant 2.000000e-01 : f32
    %41 = vector.broadcast %cst_18 : f32 to vector<32x32xf32>
    %42 = arith.mulf %41, %38 : vector<32x32xf32>
    %43 = arith.select %40, %38, %42 : vector<32x32xi1>, vector<32x32xf32>
    %44 = vector.broadcast %33 : vector<32x1xf32> to vector<32x32xf32>
    %45 = arith.subf %43, %44 : vector<32x32xf32>
    %46 = math.exp %45 : vector<32x32xf32>
    %47 = arith.truncf %46 : vector<32x32xf32> to vector<32x32xbf16>
    %48 = arith.mulf %47, %0 : vector<32x32xbf16>
    %cst_19 = arith.constant dense<0.000000e+00> : vector<32x128xf32>
    %49 = tpu.matmul %48, %24, %cst_19 {dimension_numbers = #tpu.dot_dimension_numbers<[1], [0], [0], [1], [0, 0, 1, 1], [], []>} : vector<32x32xbf16>, vector<32x128xbf16>, vector<32x128xf32> -> vector<32x128xf32>
    %50 = vector.extract_strided_slice %49 {offsets = [0, 64], sizes = [32, 1], strides = [1, 1]} : vector<32x128xf32> to vector<32x1xf32>
    %cst_20 = arith.constant 9.99999996E-13 : f32
    %51 = vector.broadcast %cst_20 : f32 to vector<32x1xf32>
    %52 = arith.maximumf %50, %51 : vector<32x1xf32>
    %53 = tpu.reciprocal %52 {approx = true} : vector<32x1xf32> -> vector<32x1xf32>
    %54 = vector.extract_strided_slice %49 {offsets = [0, 0], sizes = [32, 8], strides = [1, 1]} : vector<32x128xf32> to vector<32x8xf32>
    %55 = vector.broadcast %53 : vector<32x1xf32> to vector<32x8xf32>
    %56 = arith.mulf %54, %55 : vector<32x8xf32>
    %57 = vector.extract_strided_slice %10 {offsets = [0, 1], sizes = [32, 1], strides = [1, 1]} : vector<32x8xf32> to vector<32x1xf32>
    %58 = vector.extract_strided_slice %14 {offsets = [0, 1], sizes = [1, 1], strides = [1, 1]} : vector<1x8xf32> to vector<1x1xf32>
    %59 = vector.broadcast %58 : vector<1x1xf32> to vector<32x1xf32>
    %60 = arith.addf %57, %59 : vector<32x1xf32>
    %cst_21 = arith.constant 0.000000e+00 : f32
    %61 = vector.broadcast %cst_21 : f32 to vector<32x1xf32>
    %62 = arith.cmpf ogt, %60, %61 : vector<32x1xf32>
    %cst_22 = arith.constant 2.000000e-01 : f32
    %63 = vector.broadcast %cst_22 : f32 to vector<32x1xf32>
    %64 = arith.mulf %63, %60 : vector<32x1xf32>
    %65 = arith.select %62, %60, %64 : vector<32x1xi1>, vector<32x1xf32>
    %66 = vector.extract_strided_slice %10 {offsets = [0, 1], sizes = [32, 1], strides = [1, 1]} : vector<32x8xf32> to vector<32x1xf32>
    %67 = vector.extract_strided_slice %12 {offsets = [1, 0], sizes = [1, 32], strides = [1, 1]} : vector<8x32xf32> to vector<1x32xf32>
    %68 = vector.broadcast %66 : vector<32x1xf32> to vector<32x32xf32>
    %69 = vector.broadcast %67 : vector<1x32xf32> to vector<32x32xf32>
    %70 = arith.addf %68, %69 : vector<32x32xf32>
    %cst_23 = arith.constant 0.000000e+00 : f32
    %71 = vector.broadcast %cst_23 : f32 to vector<32x32xf32>
    %72 = arith.cmpf ogt, %70, %71 : vector<32x32xf32>
    %cst_24 = arith.constant 2.000000e-01 : f32
    %73 = vector.broadcast %cst_24 : f32 to vector<32x32xf32>
    %74 = arith.mulf %73, %70 : vector<32x32xf32>
    %75 = arith.select %72, %70, %74 : vector<32x32xi1>, vector<32x32xf32>
    %76 = vector.broadcast %65 : vector<32x1xf32> to vector<32x32xf32>
    %77 = arith.subf %75, %76 : vector<32x32xf32>
    %78 = math.exp %77 : vector<32x32xf32>
    %79 = arith.truncf %78 : vector<32x32xf32> to vector<32x32xbf16>
    %80 = arith.mulf %79, %0 : vector<32x32xbf16>
    %cst_25 = arith.constant dense<0.000000e+00> : vector<32x128xf32>
    %81 = tpu.matmul %80, %24, %cst_25 {dimension_numbers = #tpu.dot_dimension_numbers<[1], [0], [0], [1], [0, 0, 1, 1], [], []>} : vector<32x32xbf16>, vector<32x128xbf16>, vector<32x128xf32> -> vector<32x128xf32>
    %82 = vector.extract_strided_slice %81 {offsets = [0, 64], sizes = [32, 1], strides = [1, 1]} : vector<32x128xf32> to vector<32x1xf32>
    %cst_26 = arith.constant 9.99999996E-13 : f32
    %83 = vector.broadcast %cst_26 : f32 to vector<32x1xf32>
    %84 = arith.maximumf %82, %83 : vector<32x1xf32>
    %85 = tpu.reciprocal %84 {approx = true} : vector<32x1xf32> -> vector<32x1xf32>
    %86 = vector.extract_strided_slice %81 {offsets = [0, 8], sizes = [32, 8], strides = [1, 1]} : vector<32x128xf32> to vector<32x8xf32>
    %87 = vector.broadcast %85 : vector<32x1xf32> to vector<32x8xf32>
    %88 = arith.mulf %86, %87 : vector<32x8xf32>
    %89 = vector.extract_strided_slice %10 {offsets = [0, 2], sizes = [32, 1], strides = [1, 1]} : vector<32x8xf32> to vector<32x1xf32>
    %90 = vector.extract_strided_slice %14 {offsets = [0, 2], sizes = [1, 1], strides = [1, 1]} : vector<1x8xf32> to vector<1x1xf32>
    %91 = vector.broadcast %90 : vector<1x1xf32> to vector<32x1xf32>
    %92 = arith.addf %89, %91 : vector<32x1xf32>
    %cst_27 = arith.constant 0.000000e+00 : f32
    %93 = vector.broadcast %cst_27 : f32 to vector<32x1xf32>
    %94 = arith.cmpf ogt, %92, %93 : vector<32x1xf32>
    %cst_28 = arith.constant 2.000000e-01 : f32
    %95 = vector.broadcast %cst_28 : f32 to vector<32x1xf32>
    %96 = arith.mulf %95, %92 : vector<32x1xf32>
    %97 = arith.select %94, %92, %96 : vector<32x1xi1>, vector<32x1xf32>
    %98 = vector.extract_strided_slice %10 {offsets = [0, 2], sizes = [32, 1], strides = [1, 1]} : vector<32x8xf32> to vector<32x1xf32>
    %99 = vector.extract_strided_slice %12 {offsets = [2, 0], sizes = [1, 32], strides = [1, 1]} : vector<8x32xf32> to vector<1x32xf32>
    %100 = vector.broadcast %98 : vector<32x1xf32> to vector<32x32xf32>
    %101 = vector.broadcast %99 : vector<1x32xf32> to vector<32x32xf32>
    %102 = arith.addf %100, %101 : vector<32x32xf32>
    %cst_29 = arith.constant 0.000000e+00 : f32
    %103 = vector.broadcast %cst_29 : f32 to vector<32x32xf32>
    %104 = arith.cmpf ogt, %102, %103 : vector<32x32xf32>
    %cst_30 = arith.constant 2.000000e-01 : f32
    %105 = vector.broadcast %cst_30 : f32 to vector<32x32xf32>
    %106 = arith.mulf %105, %102 : vector<32x32xf32>
    %107 = arith.select %104, %102, %106 : vector<32x32xi1>, vector<32x32xf32>
    %108 = vector.broadcast %97 : vector<32x1xf32> to vector<32x32xf32>
    %109 = arith.subf %107, %108 : vector<32x32xf32>
    %110 = math.exp %109 : vector<32x32xf32>
    %111 = arith.truncf %110 : vector<32x32xf32> to vector<32x32xbf16>
    %112 = arith.mulf %111, %0 : vector<32x32xbf16>
    %cst_31 = arith.constant dense<0.000000e+00> : vector<32x128xf32>
    %113 = tpu.matmul %112, %24, %cst_31 {dimension_numbers = #tpu.dot_dimension_numbers<[1], [0], [0], [1], [0, 0, 1, 1], [], []>} : vector<32x32xbf16>, vector<32x128xbf16>, vector<32x128xf32> -> vector<32x128xf32>
    %114 = vector.extract_strided_slice %113 {offsets = [0, 64], sizes = [32, 1], strides = [1, 1]} : vector<32x128xf32> to vector<32x1xf32>
    %cst_32 = arith.constant 9.99999996E-13 : f32
    %115 = vector.broadcast %cst_32 : f32 to vector<32x1xf32>
    %116 = arith.maximumf %114, %115 : vector<32x1xf32>
    %117 = tpu.reciprocal %116 {approx = true} : vector<32x1xf32> -> vector<32x1xf32>
    %118 = vector.extract_strided_slice %113 {offsets = [0, 16], sizes = [32, 8], strides = [1, 1]} : vector<32x128xf32> to vector<32x8xf32>
    %119 = vector.broadcast %117 : vector<32x1xf32> to vector<32x8xf32>
    %120 = arith.mulf %118, %119 : vector<32x8xf32>
    %121 = vector.extract_strided_slice %10 {offsets = [0, 3], sizes = [32, 1], strides = [1, 1]} : vector<32x8xf32> to vector<32x1xf32>
    %122 = vector.extract_strided_slice %14 {offsets = [0, 3], sizes = [1, 1], strides = [1, 1]} : vector<1x8xf32> to vector<1x1xf32>
    %123 = vector.broadcast %122 : vector<1x1xf32> to vector<32x1xf32>
    %124 = arith.addf %121, %123 : vector<32x1xf32>
    %cst_33 = arith.constant 0.000000e+00 : f32
    %125 = vector.broadcast %cst_33 : f32 to vector<32x1xf32>
    %126 = arith.cmpf ogt, %124, %125 : vector<32x1xf32>
    %cst_34 = arith.constant 2.000000e-01 : f32
    %127 = vector.broadcast %cst_34 : f32 to vector<32x1xf32>
    %128 = arith.mulf %127, %124 : vector<32x1xf32>
    %129 = arith.select %126, %124, %128 : vector<32x1xi1>, vector<32x1xf32>
    %130 = vector.extract_strided_slice %10 {offsets = [0, 3], sizes = [32, 1], strides = [1, 1]} : vector<32x8xf32> to vector<32x1xf32>
    %131 = vector.extract_strided_slice %12 {offsets = [3, 0], sizes = [1, 32], strides = [1, 1]} : vector<8x32xf32> to vector<1x32xf32>
    %132 = vector.broadcast %130 : vector<32x1xf32> to vector<32x32xf32>
    %133 = vector.broadcast %131 : vector<1x32xf32> to vector<32x32xf32>
    %134 = arith.addf %132, %133 : vector<32x32xf32>
    %cst_35 = arith.constant 0.000000e+00 : f32
    %135 = vector.broadcast %cst_35 : f32 to vector<32x32xf32>
    %136 = arith.cmpf ogt, %134, %135 : vector<32x32xf32>
    %cst_36 = arith.constant 2.000000e-01 : f32
    %137 = vector.broadcast %cst_36 : f32 to vector<32x32xf32>
    %138 = arith.mulf %137, %134 : vector<32x32xf32>
    %139 = arith.select %136, %134, %138 : vector<32x32xi1>, vector<32x32xf32>
    %140 = vector.broadcast %129 : vector<32x1xf32> to vector<32x32xf32>
    %141 = arith.subf %139, %140 : vector<32x32xf32>
    %142 = math.exp %141 : vector<32x32xf32>
    %143 = arith.truncf %142 : vector<32x32xf32> to vector<32x32xbf16>
    %144 = arith.mulf %143, %0 : vector<32x32xbf16>
    %cst_37 = arith.constant dense<0.000000e+00> : vector<32x128xf32>
    %145 = tpu.matmul %144, %24, %cst_37 {dimension_numbers = #tpu.dot_dimension_numbers<[1], [0], [0], [1], [0, 0, 1, 1], [], []>} : vector<32x32xbf16>, vector<32x128xbf16>, vector<32x128xf32> -> vector<32x128xf32>
    %146 = vector.extract_strided_slice %145 {offsets = [0, 64], sizes = [32, 1], strides = [1, 1]} : vector<32x128xf32> to vector<32x1xf32>
    %cst_38 = arith.constant 9.99999996E-13 : f32
    %147 = vector.broadcast %cst_38 : f32 to vector<32x1xf32>
    %148 = arith.maximumf %146, %147 : vector<32x1xf32>
    %149 = tpu.reciprocal %148 {approx = true} : vector<32x1xf32> -> vector<32x1xf32>
    %150 = vector.extract_strided_slice %145 {offsets = [0, 24], sizes = [32, 8], strides = [1, 1]} : vector<32x128xf32> to vector<32x8xf32>
    %151 = vector.broadcast %149 : vector<32x1xf32> to vector<32x8xf32>
    %152 = arith.mulf %150, %151 : vector<32x8xf32>
    %153 = vector.extract_strided_slice %10 {offsets = [0, 4], sizes = [32, 1], strides = [1, 1]} : vector<32x8xf32> to vector<32x1xf32>
    %154 = vector.extract_strided_slice %14 {offsets = [0, 4], sizes = [1, 1], strides = [1, 1]} : vector<1x8xf32> to vector<1x1xf32>
    %155 = vector.broadcast %154 : vector<1x1xf32> to vector<32x1xf32>
    %156 = arith.addf %153, %155 : vector<32x1xf32>
    %cst_39 = arith.constant 0.000000e+00 : f32
    %157 = vector.broadcast %cst_39 : f32 to vector<32x1xf32>
    %158 = arith.cmpf ogt, %156, %157 : vector<32x1xf32>
    %cst_40 = arith.constant 2.000000e-01 : f32
    %159 = vector.broadcast %cst_40 : f32 to vector<32x1xf32>
    %160 = arith.mulf %159, %156 : vector<32x1xf32>
    %161 = arith.select %158, %156, %160 : vector<32x1xi1>, vector<32x1xf32>
    %162 = vector.extract_strided_slice %10 {offsets = [0, 4], sizes = [32, 1], strides = [1, 1]} : vector<32x8xf32> to vector<32x1xf32>
    %163 = vector.extract_strided_slice %12 {offsets = [4, 0], sizes = [1, 32], strides = [1, 1]} : vector<8x32xf32> to vector<1x32xf32>
    %164 = vector.broadcast %162 : vector<32x1xf32> to vector<32x32xf32>
    %165 = vector.broadcast %163 : vector<1x32xf32> to vector<32x32xf32>
    %166 = arith.addf %164, %165 : vector<32x32xf32>
    %cst_41 = arith.constant 0.000000e+00 : f32
    %167 = vector.broadcast %cst_41 : f32 to vector<32x32xf32>
    %168 = arith.cmpf ogt, %166, %167 : vector<32x32xf32>
    %cst_42 = arith.constant 2.000000e-01 : f32
    %169 = vector.broadcast %cst_42 : f32 to vector<32x32xf32>
    %170 = arith.mulf %169, %166 : vector<32x32xf32>
    %171 = arith.select %168, %166, %170 : vector<32x32xi1>, vector<32x32xf32>
    %172 = vector.broadcast %161 : vector<32x1xf32> to vector<32x32xf32>
    %173 = arith.subf %171, %172 : vector<32x32xf32>
    %174 = math.exp %173 : vector<32x32xf32>
    %175 = arith.truncf %174 : vector<32x32xf32> to vector<32x32xbf16>
    %176 = arith.mulf %175, %0 : vector<32x32xbf16>
    %cst_43 = arith.constant dense<0.000000e+00> : vector<32x128xf32>
    %177 = tpu.matmul %176, %24, %cst_43 {dimension_numbers = #tpu.dot_dimension_numbers<[1], [0], [0], [1], [0, 0, 1, 1], [], []>} : vector<32x32xbf16>, vector<32x128xbf16>, vector<32x128xf32> -> vector<32x128xf32>
    %178 = vector.extract_strided_slice %177 {offsets = [0, 64], sizes = [32, 1], strides = [1, 1]} : vector<32x128xf32> to vector<32x1xf32>
    %cst_44 = arith.constant 9.99999996E-13 : f32
    %179 = vector.broadcast %cst_44 : f32 to vector<32x1xf32>
    %180 = arith.maximumf %178, %179 : vector<32x1xf32>
    %181 = tpu.reciprocal %180 {approx = true} : vector<32x1xf32> -> vector<32x1xf32>
    %182 = vector.extract_strided_slice %177 {offsets = [0, 32], sizes = [32, 8], strides = [1, 1]} : vector<32x128xf32> to vector<32x8xf32>
    %183 = vector.broadcast %181 : vector<32x1xf32> to vector<32x8xf32>
    %184 = arith.mulf %182, %183 : vector<32x8xf32>
    %185 = vector.extract_strided_slice %10 {offsets = [0, 5], sizes = [32, 1], strides = [1, 1]} : vector<32x8xf32> to vector<32x1xf32>
    %186 = vector.extract_strided_slice %14 {offsets = [0, 5], sizes = [1, 1], strides = [1, 1]} : vector<1x8xf32> to vector<1x1xf32>
    %187 = vector.broadcast %186 : vector<1x1xf32> to vector<32x1xf32>
    %188 = arith.addf %185, %187 : vector<32x1xf32>
    %cst_45 = arith.constant 0.000000e+00 : f32
    %189 = vector.broadcast %cst_45 : f32 to vector<32x1xf32>
    %190 = arith.cmpf ogt, %188, %189 : vector<32x1xf32>
    %cst_46 = arith.constant 2.000000e-01 : f32
    %191 = vector.broadcast %cst_46 : f32 to vector<32x1xf32>
    %192 = arith.mulf %191, %188 : vector<32x1xf32>
    %193 = arith.select %190, %188, %192 : vector<32x1xi1>, vector<32x1xf32>
    %194 = vector.extract_strided_slice %10 {offsets = [0, 5], sizes = [32, 1], strides = [1, 1]} : vector<32x8xf32> to vector<32x1xf32>
    %195 = vector.extract_strided_slice %12 {offsets = [5, 0], sizes = [1, 32], strides = [1, 1]} : vector<8x32xf32> to vector<1x32xf32>
    %196 = vector.broadcast %194 : vector<32x1xf32> to vector<32x32xf32>
    %197 = vector.broadcast %195 : vector<1x32xf32> to vector<32x32xf32>
    %198 = arith.addf %196, %197 : vector<32x32xf32>
    %cst_47 = arith.constant 0.000000e+00 : f32
    %199 = vector.broadcast %cst_47 : f32 to vector<32x32xf32>
    %200 = arith.cmpf ogt, %198, %199 : vector<32x32xf32>
    %cst_48 = arith.constant 2.000000e-01 : f32
    %201 = vector.broadcast %cst_48 : f32 to vector<32x32xf32>
    %202 = arith.mulf %201, %198 : vector<32x32xf32>
    %203 = arith.select %200, %198, %202 : vector<32x32xi1>, vector<32x32xf32>
    %204 = vector.broadcast %193 : vector<32x1xf32> to vector<32x32xf32>
    %205 = arith.subf %203, %204 : vector<32x32xf32>
    %206 = math.exp %205 : vector<32x32xf32>
    %207 = arith.truncf %206 : vector<32x32xf32> to vector<32x32xbf16>
    %208 = arith.mulf %207, %0 : vector<32x32xbf16>
    %cst_49 = arith.constant dense<0.000000e+00> : vector<32x128xf32>
    %209 = tpu.matmul %208, %24, %cst_49 {dimension_numbers = #tpu.dot_dimension_numbers<[1], [0], [0], [1], [0, 0, 1, 1], [], []>} : vector<32x32xbf16>, vector<32x128xbf16>, vector<32x128xf32> -> vector<32x128xf32>
    %210 = vector.extract_strided_slice %209 {offsets = [0, 64], sizes = [32, 1], strides = [1, 1]} : vector<32x128xf32> to vector<32x1xf32>
    %cst_50 = arith.constant 9.99999996E-13 : f32
    %211 = vector.broadcast %cst_50 : f32 to vector<32x1xf32>
    %212 = arith.maximumf %210, %211 : vector<32x1xf32>
    %213 = tpu.reciprocal %212 {approx = true} : vector<32x1xf32> -> vector<32x1xf32>
    %214 = vector.extract_strided_slice %209 {offsets = [0, 40], sizes = [32, 8], strides = [1, 1]} : vector<32x128xf32> to vector<32x8xf32>
    %215 = vector.broadcast %213 : vector<32x1xf32> to vector<32x8xf32>
    %216 = arith.mulf %214, %215 : vector<32x8xf32>
    %217 = vector.extract_strided_slice %10 {offsets = [0, 6], sizes = [32, 1], strides = [1, 1]} : vector<32x8xf32> to vector<32x1xf32>
    %218 = vector.extract_strided_slice %14 {offsets = [0, 6], sizes = [1, 1], strides = [1, 1]} : vector<1x8xf32> to vector<1x1xf32>
    %219 = vector.broadcast %218 : vector<1x1xf32> to vector<32x1xf32>
    %220 = arith.addf %217, %219 : vector<32x1xf32>
    %cst_51 = arith.constant 0.000000e+00 : f32
    %221 = vector.broadcast %cst_51 : f32 to vector<32x1xf32>
    %222 = arith.cmpf ogt, %220, %221 : vector<32x1xf32>
    %cst_52 = arith.constant 2.000000e-01 : f32
    %223 = vector.broadcast %cst_52 : f32 to vector<32x1xf32>
    %224 = arith.mulf %223, %220 : vector<32x1xf32>
    %225 = arith.select %222, %220, %224 : vector<32x1xi1>, vector<32x1xf32>
    %226 = vector.extract_strided_slice %10 {offsets = [0, 6], sizes = [32, 1], strides = [1, 1]} : vector<32x8xf32> to vector<32x1xf32>
    %227 = vector.extract_strided_slice %12 {offsets = [6, 0], sizes = [1, 32], strides = [1, 1]} : vector<8x32xf32> to vector<1x32xf32>
    %228 = vector.broadcast %226 : vector<32x1xf32> to vector<32x32xf32>
    %229 = vector.broadcast %227 : vector<1x32xf32> to vector<32x32xf32>
    %230 = arith.addf %228, %229 : vector<32x32xf32>
    %cst_53 = arith.constant 0.000000e+00 : f32
    %231 = vector.broadcast %cst_53 : f32 to vector<32x32xf32>
    %232 = arith.cmpf ogt, %230, %231 : vector<32x32xf32>
    %cst_54 = arith.constant 2.000000e-01 : f32
    %233 = vector.broadcast %cst_54 : f32 to vector<32x32xf32>
    %234 = arith.mulf %233, %230 : vector<32x32xf32>
    %235 = arith.select %232, %230, %234 : vector<32x32xi1>, vector<32x32xf32>
    %236 = vector.broadcast %225 : vector<32x1xf32> to vector<32x32xf32>
    %237 = arith.subf %235, %236 : vector<32x32xf32>
    %238 = math.exp %237 : vector<32x32xf32>
    %239 = arith.truncf %238 : vector<32x32xf32> to vector<32x32xbf16>
    %240 = arith.mulf %239, %0 : vector<32x32xbf16>
    %cst_55 = arith.constant dense<0.000000e+00> : vector<32x128xf32>
    %241 = tpu.matmul %240, %24, %cst_55 {dimension_numbers = #tpu.dot_dimension_numbers<[1], [0], [0], [1], [0, 0, 1, 1], [], []>} : vector<32x32xbf16>, vector<32x128xbf16>, vector<32x128xf32> -> vector<32x128xf32>
    %242 = vector.extract_strided_slice %241 {offsets = [0, 64], sizes = [32, 1], strides = [1, 1]} : vector<32x128xf32> to vector<32x1xf32>
    %cst_56 = arith.constant 9.99999996E-13 : f32
    %243 = vector.broadcast %cst_56 : f32 to vector<32x1xf32>
    %244 = arith.maximumf %242, %243 : vector<32x1xf32>
    %245 = tpu.reciprocal %244 {approx = true} : vector<32x1xf32> -> vector<32x1xf32>
    %246 = vector.extract_strided_slice %241 {offsets = [0, 48], sizes = [32, 8], strides = [1, 1]} : vector<32x128xf32> to vector<32x8xf32>
    %247 = vector.broadcast %245 : vector<32x1xf32> to vector<32x8xf32>
    %248 = arith.mulf %246, %247 : vector<32x8xf32>
    %249 = vector.extract_strided_slice %10 {offsets = [0, 7], sizes = [32, 1], strides = [1, 1]} : vector<32x8xf32> to vector<32x1xf32>
    %250 = vector.extract_strided_slice %14 {offsets = [0, 7], sizes = [1, 1], strides = [1, 1]} : vector<1x8xf32> to vector<1x1xf32>
    %251 = vector.broadcast %250 : vector<1x1xf32> to vector<32x1xf32>
    %252 = arith.addf %249, %251 : vector<32x1xf32>
    %cst_57 = arith.constant 0.000000e+00 : f32
    %253 = vector.broadcast %cst_57 : f32 to vector<32x1xf32>
    %254 = arith.cmpf ogt, %252, %253 : vector<32x1xf32>
    %cst_58 = arith.constant 2.000000e-01 : f32
    %255 = vector.broadcast %cst_58 : f32 to vector<32x1xf32>
    %256 = arith.mulf %255, %252 : vector<32x1xf32>
    %257 = arith.select %254, %252, %256 : vector<32x1xi1>, vector<32x1xf32>
    %258 = vector.extract_strided_slice %10 {offsets = [0, 7], sizes = [32, 1], strides = [1, 1]} : vector<32x8xf32> to vector<32x1xf32>
    %259 = vector.extract_strided_slice %12 {offsets = [7, 0], sizes = [1, 32], strides = [1, 1]} : vector<8x32xf32> to vector<1x32xf32>
    %260 = vector.broadcast %258 : vector<32x1xf32> to vector<32x32xf32>
    %261 = vector.broadcast %259 : vector<1x32xf32> to vector<32x32xf32>
    %262 = arith.addf %260, %261 : vector<32x32xf32>
    %cst_59 = arith.constant 0.000000e+00 : f32
    %263 = vector.broadcast %cst_59 : f32 to vector<32x32xf32>
    %264 = arith.cmpf ogt, %262, %263 : vector<32x32xf32>
    %cst_60 = arith.constant 2.000000e-01 : f32
    %265 = vector.broadcast %cst_60 : f32 to vector<32x32xf32>
    %266 = arith.mulf %265, %262 : vector<32x32xf32>
    %267 = arith.select %264, %262, %266 : vector<32x32xi1>, vector<32x32xf32>
    %268 = vector.broadcast %257 : vector<32x1xf32> to vector<32x32xf32>
    %269 = arith.subf %267, %268 : vector<32x32xf32>
    %270 = math.exp %269 : vector<32x32xf32>
    %271 = arith.truncf %270 : vector<32x32xf32> to vector<32x32xbf16>
    %272 = arith.mulf %271, %0 : vector<32x32xbf16>
    %cst_61 = arith.constant dense<0.000000e+00> : vector<32x128xf32>
    %273 = tpu.matmul %272, %24, %cst_61 {dimension_numbers = #tpu.dot_dimension_numbers<[1], [0], [0], [1], [0, 0, 1, 1], [], []>} : vector<32x32xbf16>, vector<32x128xbf16>, vector<32x128xf32> -> vector<32x128xf32>
    %274 = vector.extract_strided_slice %273 {offsets = [0, 64], sizes = [32, 1], strides = [1, 1]} : vector<32x128xf32> to vector<32x1xf32>
    %cst_62 = arith.constant 9.99999996E-13 : f32
    %275 = vector.broadcast %cst_62 : f32 to vector<32x1xf32>
    %276 = arith.maximumf %274, %275 : vector<32x1xf32>
    %277 = tpu.reciprocal %276 {approx = true} : vector<32x1xf32> -> vector<32x1xf32>
    %278 = vector.extract_strided_slice %273 {offsets = [0, 56], sizes = [32, 8], strides = [1, 1]} : vector<32x128xf32> to vector<32x8xf32>
    %279 = vector.broadcast %277 : vector<32x1xf32> to vector<32x8xf32>
    %280 = arith.mulf %278, %279 : vector<32x8xf32>
    %281 = tpu.concatenate %56, %88, %120, %152, %184, %216, %248, %280 in 1 : vector<32x8xf32>, vector<32x8xf32>, vector<32x8xf32>, vector<32x8xf32>, vector<32x8xf32>, vector<32x8xf32>, vector<32x8xf32>, vector<32x8xf32> -> vector<32x64xf32>
    %282 = vector.broadcast %5 : vector<1x64xf32> to vector<32x64xf32>
    %283 = arith.addf %281, %282 : vector<32x64xf32>
    %cst_63 = arith.constant 0.000000e+00 : f32
    %284 = vector.broadcast %cst_63 : f32 to vector<32x64xf32>
    %285 = arith.cmpf ogt, %283, %284 : vector<32x64xf32>
    %286 = math.exp %283 : vector<32x64xf32>
    %cst_64 = arith.constant 1.000000e+00 : f32
    %287 = vector.broadcast %cst_64 : f32 to vector<32x64xf32>
    %288 = arith.subf %286, %287 : vector<32x64xf32>
    %289 = arith.select %285, %283, %288 : vector<32x64xi1>, vector<32x64xf32>
    %290 = arith.truncf %289 : vector<32x64xf32> to vector<32x64xbf16>
    %cst_65 = arith.constant dense<0.000000e+00> : vector<32x128xf32>
    %291 = tpu.matmul %290, %7, %cst_65 {dimension_numbers = #tpu.dot_dimension_numbers<[1], [0], [0], [1], [0, 0, 1, 1], [], []>} : vector<32x64xbf16>, vector<64x128xbf16>, vector<32x128xf32> -> vector<32x128xf32>
    %292 = vector.extract_strided_slice %291 {offsets = [0, 126], sizes = [32, 1], strides = [1, 1]} : vector<32x128xf32> to vector<32x1xf32>
    %293 = vector.extract_strided_slice %291 {offsets = [0, 127], sizes = [32, 1], strides = [1, 1]} : vector<32x128xf32> to vector<32x1xf32>
    %294 = tpu.transpose %293, [1, 0] : vector<32x1xf32> -> vector<1x32xf32>
    %cst_66 = arith.constant dense<0xFF800000> : vector<1xf32>
    %295 = vector.multi_reduction <maximumf>, %293, %cst_66 [0] : vector<32x1xf32> to vector<1xf32>
    %296 = vector.shape_cast %295 : vector<1xf32> to vector<1x1xf32>
    %297 = tpu.iota {dimensions = array<i32: 1>} : vector<32x128xi32>
    %c4_i32 = arith.constant 4 : i32
    %298 = vector.broadcast %c4_i32 : i32 to vector<32x128xi32>
    %299 = arith.cmpi slt, %297, %298 : vector<32x128xi32>
    %c4_i32_67 = arith.constant 4 : i32
    %300 = vector.broadcast %c4_i32_67 : i32 to vector<32x128xi32>
    %301 = arith.cmpi eq, %297, %300 : vector<32x128xi32>
    %cst_68 = arith.constant 1.000000e+00 : f32
    %cst_69 = arith.constant 0.000000e+00 : f32
    %302 = vector.broadcast %cst_68 : f32 to vector<32x128xf32>
    %303 = vector.broadcast %cst_69 : f32 to vector<32x128xf32>
    %304 = arith.select %301, %302, %303 : vector<32x128xi1>, vector<32x128xf32>
    %305 = arith.select %299, %291, %304 : vector<32x128xi1>, vector<32x128xf32>
    %306 = arith.truncf %305 : vector<32x128xf32> to vector<32x128xbf16>
    %307 = vector.broadcast %296 : vector<1x1xf32> to vector<32x1xf32>
    %308 = arith.addf %292, %307 : vector<32x1xf32>
    %cst_70 = arith.constant 0.000000e+00 : f32
    %309 = vector.broadcast %cst_70 : f32 to vector<32x1xf32>
    %310 = arith.cmpf ogt, %308, %309 : vector<32x1xf32>
    %cst_71 = arith.constant 2.000000e-01 : f32
    %311 = vector.broadcast %cst_71 : f32 to vector<32x1xf32>
    %312 = arith.mulf %311, %308 : vector<32x1xf32>
    %313 = arith.select %310, %308, %312 : vector<32x1xi1>, vector<32x1xf32>
    %314 = vector.broadcast %292 : vector<32x1xf32> to vector<32x32xf32>
    %315 = vector.broadcast %294 : vector<1x32xf32> to vector<32x32xf32>
    %316 = arith.addf %314, %315 : vector<32x32xf32>
    %cst_72 = arith.constant 0.000000e+00 : f32
    %317 = vector.broadcast %cst_72 : f32 to vector<32x32xf32>
    %318 = arith.cmpf ogt, %316, %317 : vector<32x32xf32>
    %cst_73 = arith.constant 2.000000e-01 : f32
    %319 = vector.broadcast %cst_73 : f32 to vector<32x32xf32>
    %320 = arith.mulf %319, %316 : vector<32x32xf32>
    %321 = arith.select %318, %316, %320 : vector<32x32xi1>, vector<32x32xf32>
    %322 = vector.broadcast %313 : vector<32x1xf32> to vector<32x32xf32>
    %323 = arith.subf %321, %322 : vector<32x32xf32>
    %324 = math.exp %323 : vector<32x32xf32>
    %325 = arith.truncf %324 : vector<32x32xf32> to vector<32x32xbf16>
    %326 = arith.mulf %325, %0 : vector<32x32xbf16>
    %cst_74 = arith.constant dense<0.000000e+00> : vector<32x128xf32>
    %327 = tpu.matmul %326, %306, %cst_74 {dimension_numbers = #tpu.dot_dimension_numbers<[1], [0], [0], [1], [0, 0, 1, 1], [], []>} : vector<32x32xbf16>, vector<32x128xbf16>, vector<32x128xf32> -> vector<32x128xf32>
    %328 = vector.extract_strided_slice %327 {offsets = [0, 4], sizes = [32, 1], strides = [1, 1]} : vector<32x128xf32> to vector<32x1xf32>
    %cst_75 = arith.constant 9.99999996E-13 : f32
    %329 = vector.broadcast %cst_75 : f32 to vector<32x1xf32>
    %330 = arith.maximumf %328, %329 : vector<32x1xf32>
    %331 = tpu.reciprocal %330 {approx = true} : vector<32x1xf32> -> vector<32x1xf32>
    %332 = vector.broadcast %331 : vector<32x1xf32> to vector<32x128xf32>
    %333 = arith.mulf %327, %332 : vector<32x128xf32>
    %334 = vector.broadcast %8 : vector<1x128xf32> to vector<32x128xf32>
    %335 = arith.addf %333, %334 : vector<32x128xf32>
    %c4_i32_76 = arith.constant 4 : i32
    %336 = vector.broadcast %c4_i32_76 : i32 to vector<32x128xi32>
    %337 = arith.cmpi slt, %297, %336 : vector<32x128xi32>
    %cst_77 = arith.constant -1.000000e+30 : f32
    %338 = vector.broadcast %cst_77 : f32 to vector<32x128xf32>
    %339 = arith.select %337, %335, %338 : vector<32x128xi1>, vector<32x128xf32>
    %cst_78 = arith.constant dense<0xFF800000> : vector<32xf32>
    %340 = vector.multi_reduction <maximumf>, %339, %cst_78 [1] : vector<32x128xf32> to vector<32xf32>
    %341 = vector.shape_cast %340 : vector<32xf32> to vector<32x1xf32>
    %342 = vector.broadcast %341 : vector<32x1xf32> to vector<32x128xf32>
    %343 = arith.subf %339, %342 : vector<32x128xf32>
    %344 = math.exp %343 : vector<32x128xf32>
    %cst_79 = arith.constant dense<0.000000e+00> : vector<32xf32>
    %345 = vector.multi_reduction <add>, %344, %cst_79 [1] : vector<32x128xf32> to vector<32xf32>
    %346 = vector.shape_cast %345 : vector<32xf32> to vector<32x1xf32>
    %347 = math.log %346 : vector<32x1xf32>
    %348 = arith.addf %341, %347 : vector<32x1xf32>
    %349 = vector.broadcast %348 : vector<32x1xf32> to vector<32x128xf32>
    %350 = arith.subf %335, %349 : vector<32x128xf32>
    %cst_80 = arith.constant 0.000000e+00 : f32
    %351 = vector.broadcast %cst_80 : f32 to vector<32x128xf32>
    %352 = arith.select %337, %350, %351 : vector<32x128xi1>, vector<32x128xf32>
    %c0_81 = arith.constant 0 : index
    %c0_82 = arith.constant 0 : index
    %353 = vector.load %arg6[%c0_81, %c0_82] : memref<32x128xf32, #tpu.memory_space<vmem>>, vector<32x128xf32>
    tpu.vector_store %arg6[%c0_81, %c0_82], %352 {strides = array<i32>} : memref<32x128xf32, #tpu.memory_space<vmem>>, vector<32x128xf32>,
    return
  }
}

</mosaic_0001>

<bundles_post_ra>
// kernel: tpu_custom_call.1
= control target key start
LH: loop header
LB: loop body
LE: loop exit
PB: predicated region body
PF: predicated region fallthrough
CT: control target
= control target key end

     0   :  { %11 = vsyncpa [#allocation3], 0  ;;  %s3211_s0 = inlined_call_operand.hbm [shape: f32[32,128], index: 0, kind: input, shape index: {}]   ;;  %s3212_s1 = inlined_call_operand.hbm [shape: f32[128,128], index: 1, kind: input, shape index: {}]   ;;  %s3213_s2 = inlined_call_operand.vmem [shape: f32[1,64], index: 2, kind: input, shape index: {}]   ;;  %s3214_s3 = inlined_call_operand.hbm [shape: f32[64,128], index: 3, kind: input, shape index: {}]   ;;  %s3215_s4 = inlined_call_operand.vmem [shape: f32[1,128], index: 4, kind: input, shape index: {}]   ;;  %s3216_s5 = inlined_call_operand.vmem [shape: bf16[32,32], index: 5, kind: input, shape index: {}]   ;;  %s3217_s6 = inlined_call_operand.hbm [shape: f32[32,128], index: 6, kind: output, shape index: {}]  }
   0x1   :  { %12 = vsyncpa [#allocation6], 0 }
   0x2   :  { %13 = vsyncpa [#allocation4], 0  ;;  %s2491_s21 = smov [#allocation5]   ;;  %s2492_s23 = smov [#allocation2]  }
   0x3   :  { %s31_s22 = sshll.u32 %s2491_s21, 4  ;;  %s19_s24 = sshll.u32 %s2492_s23, 4  ;;  %s32_s22 = int_to_ptr.vmem [resolvable:$true] %s31_s22  ;;  %s2547_s24 = int_to_ptr.vmem [resolvable:$true] %s19_s24 }
   0x4   :  { %s2397_s27 = scalar_lea.hbm %s3212_s1, 2048 }
   0x5   :  { %p2398_p0 = scmp.ne.s32.totalorder %s3212_s1, %s2397_s27  ;;  %p2401_p1 = scmp.lt.u32.totalorder %s2397_s27, %s3212_s1 }
   0x7   :  { %p2403_p2 = pnand %p2401_p1, %p2398_p0 }
   0x9   :  { %2406 = shalt.err (!%p2403_p2)
}
   0xa   :  { %s2407_s8 = scalar_lea.vmem %s32_s22, 2048  ;;  %p2412_p4 = scmp.lt.s32.totalorder %s32_s22, %s32_s22 }
   0xb   :  { %p2408_p3 = scmp.ne.s32.totalorder %s32_s22, %s2407_s8  ;;  %p2413_p5 = scmp.lt.s32.totalorder %s2407_s8, %s2407_s8 }
   0xd   :  { %p2414_p6 = por %p2413_p5, %p2412_p4 }
   0xf   :  { %p2415_p7 = pnand %p2414_p6, %p2408_p3 }
  0x11   :  { %2418 = shalt.err (!%p2415_p7)
}
  0x12   :  { %s2493_s9 = smov 128   ;;  %s2494_s10 = smov 8  }
  0x13   :  { %37 = dma.hbm_to_vmem [thread:$0]  %s3212_s1, 2048, %s32_s22, [#allocation6], %s2493_s9, %s2493_s9, %s2494_s10  }
  0x14   :  { %s2419_s15 = scalar_lea.hbm %s3211_s0, 512 }
  0x15   :  { %p2420_p8 = scmp.ne.s32.totalorder %s3211_s0, %s2419_s15  ;;  %p2423_p9 = scmp.lt.u32.totalorder %s2419_s15, %s3211_s0 }
  0x17   :  { %p2425_p10 = pnand %p2423_p9, %p2420_p8 }
  0x19   :  { %2428 = shalt.err (!%p2425_p10)
}
  0x1a   :  { %s2429_s20 = scalar_lea.vmem %s2547_s24, 512  ;;  %p2434_p12 = scmp.lt.s32.totalorder %s2547_s24, %s2547_s24 }
  0x1b   :  { %p2430_p11 = scmp.ne.s32.totalorder %s2547_s24, %s2429_s20  ;;  %p2435_p13 = scmp.lt.s32.totalorder %s2429_s20, %s2429_s20 }
  0x1d   :  { %p2436_p0 = por %p2435_p13, %p2434_p12 }
  0x1f   :  { %p2437_p1 = pnand %p2436_p0, %p2430_p11 }
  0x21   :  { %2440 = shalt.err (!%p2437_p1)
}
  0x22   :  { %25 = dma.hbm_to_vmem [thread:$0]  %s3211_s0, 512, %s2547_s24, [#allocation3], %s2493_s9, %s2493_s9, %s2494_s10  }
  0x23   :  { %s2495_s22 = smov [#allocation7]   ;;  %s2441_s27 = scalar_lea.hbm %s3214_s3, 1024 }
  0x24   :  { %s45_s23 = sshll.u32 %s2495_s22, 4  ;;  %p2442_p2 = scmp.ne.s32.totalorder %s3214_s3, %s2441_s27  ;;  %s46_s23 = int_to_ptr.vmem [resolvable:$true] %s45_s23 }
  0x25   :  { %p2445_p3 = scmp.lt.u32.totalorder %s2441_s27, %s3214_s3 }
  0x27   :  { %p2447_p4 = pnand %p2445_p3, %p2442_p2 }
  0x29   :  { %2450 = shalt.err (!%p2447_p4)
}
  0x2a   :  { %s2451_s8 = scalar_lea.vmem %s46_s23, 1024  ;;  %p2456_p6 = scmp.lt.s32.totalorder %s46_s23, %s46_s23 }
  0x2b   :  { %p2452_p5 = scmp.ne.s32.totalorder %s46_s23, %s2451_s8  ;;  %p2457_p7 = scmp.lt.s32.totalorder %s2451_s8, %s2451_s8 }
  0x2d   :  { %p2458_p8 = por %p2457_p7, %p2456_p6 }
  0x2f   :  { %p2459_p9 = pnand %p2458_p8, %p2452_p5 }
  0x31   :  { %2462 = shalt.err (!%p2459_p9)
}
  0x32   :  { %51 = dma.hbm_to_vmem [thread:$0]  %s3214_s3, 1024, %s46_s23, [#allocation6], %s2493_s9, %s2493_s9, %s2494_s10  }
  0x33   :  { %2485 = dma.done.wait [#allocation3], 512  }
  0x34   :  { %2486 = vsyncadd [#allocation3], 4294966784 }
  0x35   :  { %2487 = dma.done.wait [#allocation6], 3072  }
  0x36   :  { %2488 = vsyncadd [#allocation6], 4294964224  ;;  %v2496_v0 = vmov 68   ;;  %v76_v1 = vld [vmem:[#allocation5] sm:$0xff]  ;;  %v77_v2 = vld [vmem:[#allocation5 + $0x8] sm:$0xff]  ;;  %v2497_v31 = vmov 64   ;;  %v225_v32 = vlaneseq }
  0x37   :  { %2178 = vset.pattern.permute.xlu0 %v2496_v0  ;;  %v78_v3 = vld [vmem:[#allocation5 + $0x10] sm:$0xff]  ;;  %v92_v4 = vpack.c.bf16 %v77_v2, %v76_v1  ;;  %v79_v5 = vld [vmem:[#allocation5 + $0x18] sm:$0xff]  ;;  %v80_v7 = vld [vmem:[#allocation5 + $0x20] sm:$0xff]  ;;  %2174 = vset.pattern.permute.xlu1 %v2497_v31  ;;  %v2498_v34 = vmov 0.0   ;;  %vm211_vm2 = vcmask 654912   ;;  %s2499_s3 = smov 56  }
  0x38   :  { %v93_v6 = vpack.c.bf16 %v79_v5, %v78_v3  ;;  %v81_v8 = vld [vmem:[#allocation5 + $0x28] sm:$0xff]  ;;  %v70_v10 = vld [vmem:[#allocation2] sm:$0xff]  ;;  %v82_v12 = vld [vmem:[#allocation5 + $0x30] sm:$0xff]  ;;  %v2602_v33 = vand.u32 127, %v225_v32  ;;  %v2500_v51 = vmov 69   ;;  %v2501_v54 = vmov 65  }
  0x39   :  { %2049 = vmatprep.subr.bf16.mxu0 %v92_v4  ;;  %v94_v9 = vpack.c.bf16 %v81_v8, %v80_v7  ;;  %v71_v11 = vld [vmem:[#allocation2 + $0x8] sm:$0xff]  ;;  %v83_v13 = vld [vmem:[#allocation5 + $0x38] sm:$0xff]  ;;  %v84_v16 = vld [vmem:[#allocation5 + $0x40] sm:$0xff]  ;;  %v2502_v55 = vmov 66   ;;  %v2503_v56 = vmov 67   ;;  %v2504_v57 = vmov 70  }
  0x3a   :  { %2050 = vmatpush3.bf16.msra.mxu0 %v92_v4  ;;  %v74_v14 = vpack.c.bf16 %v71_v11, %v70_v10  ;;  %v95_v15 = vpack.c.bf16 %v83_v13, %v82_v12  ;;  %v85_v17 = vld [vmem:[#allocation5 + $0x48] sm:$0xff]  ;;  %v86_v19 = vld [vmem:[#allocation5 + $0x50] sm:$0xff]  ;;  %v87_v20 = vld [vmem:[#allocation5 + $0x58] sm:$0xff]  ;;  %vm228_vm0 = vcmp.eq.s32.totalorder %v2602_v33, 64  ;;  %vm227_vm1 = vcmp.lt.s32.totalorder %v2602_v33, 64  ;;  %s2506_s11 = smov 120  }
  0x3b   :  { %2051 = vmatprep.subr.bf16.mxu0 %v93_v6  ;;  %v96_v18 = vpack.c.bf16 %v85_v17, %v84_v16  ;;  %v97_v21 = vpack.c.bf16 %v87_v20, %v86_v19  ;;  %v88_v22 = vld [vmem:[#allocation5 + $0x60] sm:$0xff]  ;;  %v89_v23 = vld [vmem:[#allocation5 + $0x68] sm:$0xff]  ;;  %v90_v25 = vld [vmem:[#allocation5 + $0x70] sm:$0xff]  ;;  %v229_v35 = vsel %vm228_vm0, 1.0, %v2498_v34  ;;  %v2505_v58 = vmov 71   ;;  %s2509_s18 = smov 127  }
  0x3c   :  { %2065 = vmatprep.mubr.bf16.mxu0 %v74_v14  ;;  %v98_v24 = vpack.c.bf16 %v89_v23, %v88_v22  ;;  %v91_v26 = vld [vmem:[#allocation5 + $0x78] sm:$0xff]  ;;  %v72_v28 = vld [vmem:[#allocation2 + $0x10] sm:$0xff] }
  0x3d   :  { %v99_v27 = vpack.c.bf16 %v91_v26, %v90_v25  ;;  %v73_v29 = vld [vmem:[#allocation2 + $0x18] sm:$0xff] }
  0x3e   :  { %2052 = vmatpush3.bf16.msra.mxu0 %v93_v6  ;;  %v75_v30 = vpack.c.bf16 %v73_v29, %v72_v28 }
  0x3f   :  { %2053 = vmatprep.subr.bf16.mxu0 %v94_v9 }
  0x42   :  { %2054 = vmatpush3.bf16.msra.mxu0 %v94_v9 }
  0x43   :  { %2055 = vmatprep.subr.bf16.mxu0 %v95_v15 }
  0x46   :  { %2056 = vmatpush3.bf16.msra.mxu0 %v95_v15 }
  0x47   :  { %2057 = vmatprep.subr.bf16.mxu0 %v96_v18 }
  0x4a   :  { %2058 = vmatpush3.bf16.msra.mxu0 %v96_v18 }
  0x4b   :  { %2059 = vmatprep.subr.bf16.mxu0 %v97_v21 }
  0x4e   :  { %2060 = vmatpush3.bf16.msra.mxu0 %v97_v21 }
  0x4f   :  { %2061 = vmatprep.subr.bf16.mxu0 %v98_v24 }
  0x52   :  { %2062 = vmatpush3.bf16.msra.mxu0 %v98_v24 }
  0x53   :  { %2063 = vmatprep.subr.bf16.mxu0 %v99_v27 }
  0x56   :  { %2064 = vmatpush3.bf16.msra.mxu0 %v99_v27 }
  0x59   :  { %2066 = vmatmul.mubr.bf16.vlgmr.msra.gmra.mrb[0].mxu0 %v75_v30 }
 0x12c   :  { %v2607_v36 = vpop.f32.mrb[0].mxu0 }
 0x12d   :  { %902 = vperm.xlu0 %2178, %v2607_v36   ;;  %171 = vrot.lane.b32.xlu1 %v2607_v36, %s2499_s3  ;;  %v2612_v37 = vpop.f32.mrb[1].mxu0  ;;  %v232_v38 = vsel %vm227_vm1, %v2607_v36, %v229_v35  ;;  %v214_v40 = vsel %vm211_vm2, %v2607_v36, -inf }
 0x12e   :  { %v2617_v39 = vpop.f32.mrb[2].mxu0  ;;  %v230_v41 = vsel %vm227_vm1, %v2612_v37, %v229_v35  ;;  %v212_v44 = vsel %vm211_vm2, %v2612_v37, -inf }
 0x12f   :  { %v233_v42 = vsel %vm227_vm1, %v2617_v39, %v229_v35  ;;  %v2627_v43 = vpop.f32.mrb[3].mxu0  ;;  %v215_v45 = vsel %vm211_vm2, %v2617_v39, -inf }
 0x130   :  { %v2633_v46 = vpack.c.bf16 %v233_v42, %v232_v38  ;;  %v231_v47 = vsel %vm227_vm1, %v2627_v43, %v229_v35  ;;  %v213_v48 = vsel %vm211_vm2, %v2627_v43, -inf  ;;  %v217_v49 = vmax.f32 %v214_v40, %v215_v45 }
 0x131   :  { %v2640_v50 = vpack.c.bf16 %v231_v47, %v230_v41  ;;  %2179 = vset.pattern.permute.xlu0 %v2500_v51  ;;  %265 = vperm.xlu1 %2174, %v2607_v36   ;;  %v216_v52 = vmax.f32 %v212_v44, %v213_v48 }
 0x132   :  { %1057 = vperm.xlu0 %2179, %v2607_v36  }
 0x133   :  { %2069 = vmatprep.subr.bf16.mxu1 %v2640_v50  ;;  %2101 = vmatprep.subr.bf16.mxu0 %v2640_v50  ;;  %v2647_v53 = vmax.f32 %v216_v52, %v217_v49 }
 0x134   :  { %2070 = vmatpush3.bf16.msra.mxu1 %v2640_v50  ;;  %2102 = vmatpush3.bf16.msra.mxu0 %v2640_v50 }
 0x135   :  { %2175 = vset.pattern.permute.xlu1 %v2501_v54  ;;  %2071 = vmatprep.subr.bf16.mxu1 %v2633_v46  ;;  %v219_v59 = vrot.slane %v2647_v53, 4 }
 0x136   :  { %2103 = vmatprep.subr.bf16.mxu0 %v2633_v46  ;;  %437 = vperm.xlu1 %2175, %v2607_v36  }
 0x137   :  { %167 = vrot.lane.b32.xlu0 %v2612_v37, %s2499_s3  ;;  %v220_v60 = vmax.f32 %v2647_v53, %v219_v59 }
 0x138   :  { %2072 = vmatpush3.bf16.msra.mxu1 %v2633_v46  ;;  %2104 = vmatpush3.bf16.msra.mxu0 %v2633_v46 }
 0x139   :  { %2183 = vset.pattern.permute.xlu0 %v2501_v54  ;;  %2077 = vmatprep.subr.bf16.mxu1 %v2640_v50  ;;  %v221_v61 = vrot.slane %v220_v60, 2 }
 0x13a   :  { %2117 = vmatprep.subr.bf16.mxu0 %v2640_v50  ;;  %2176 = vset.pattern.permute.xlu1 %v2502_v55 }
 0x13b   :  { %429 = vperm.xlu0 %2183, %v2612_v37   ;;  %592 = vperm.xlu1 %2176, %v2607_v36   ;;  %v222_v62 = vmax.f32 %v220_v60, %v221_v61 }
 0x13d   :  { %v223_v63 = vrot.slane %v222_v62, 1 }
 0x13f   :  { %2185 = vset.pattern.permute.xlu0 %v2503_v56  ;;  %2177 = vset.pattern.permute.xlu1 %v2503_v56  ;;  %v224_v1 = vmax.f32 %v222_v62, %v223_v63 }
 0x140   :  { %739 = vperm.xlu0 %2185, %v2612_v37   ;;  %747 = vperm.xlu1 %2177, %v2607_v36  }
 0x144   :  { %2186 = vset.pattern.permute.xlu0 %v2496_v0  ;;  %2180 = vset.pattern.permute.xlu1 %v2504_v57 }
 0x145   :  { %894 = vperm.xlu0 %2186, %v2612_v37   ;;  %1212 = vperm.xlu1 %2180, %v2607_v36  }
 0x149   :  { %2187 = vset.pattern.permute.xlu0 %v2500_v51  ;;  %2181 = vset.pattern.permute.xlu1 %v2505_v58 }
 0x14a   :  { %1049 = vperm.xlu0 %2187, %v2612_v37   ;;  %1367 = vperm.xlu1 %2181, %v2607_v36  }
 0x14e   :  { %2188 = vset.pattern.permute.xlu0 %v2504_v57  ;;  %2182 = vset.pattern.permute.xlu1 %v2497_v31 }
 0x14f   :  { %1204 = vperm.xlu0 %2188, %v2612_v37   ;;  %257 = vperm.xlu1 %2182, %v2612_v37  }
 0x153   :  { %173 = vrot.lane.b32.xlu0 %v2617_v39, %s2499_s3  ;;  %2184 = vset.pattern.permute.xlu1 %v2502_v55 }
 0x154   :  { %584 = vperm.xlu1 %2184, %v2612_v37   ;;  %2191 = vset.pattern.permute.xlu0 %v2501_v54 }
 0x157   :  { %441 = vperm.xlu0 %2191, %v2617_v39  }
 0x158   :  { %2189 = vset.pattern.permute.xlu1 %v2505_v58 }
 0x159   :  { %1359 = vperm.xlu1 %2189, %v2612_v37  }
 0x15b   :  { %2193 = vset.pattern.permute.xlu0 %v2503_v56 }
 0x15c   :  { %751 = vperm.xlu0 %2193, %v2617_v39  }
 0x15d   :  { %2190 = vset.pattern.permute.xlu1 %v2497_v31 }
 0x15e   :  { %269 = vperm.xlu1 %2190, %v2617_v39  }
 0x160   :  { %2194 = vset.pattern.permute.xlu0 %v2496_v0 }
 0x161   :  { %906 = vperm.xlu0 %2194, %v2617_v39  }
 0x162   :  { %2192 = vset.pattern.permute.xlu1 %v2502_v55 }
 0x163   :  { %596 = vperm.xlu1 %2192, %v2617_v39  }
 0x165   :  { %2196 = vset.pattern.permute.xlu0 %v2504_v57 }
 0x166   :  { %1216 = vperm.xlu0 %2196, %v2617_v39  }
 0x167   :  { %2195 = vset.pattern.permute.xlu1 %v2500_v51 }
 0x168   :  { %1061 = vperm.xlu1 %2195, %v2617_v39  }
 0x16a   :  { %2198 = vset.pattern.permute.xlu0 %v2497_v31 }
 0x16b   :  { %261 = vperm.xlu0 %2198, %v2627_v43  }
 0x16c   :  { %2197 = vset.pattern.permute.xlu1 %v2505_v58 }
 0x16d   :  { %1371 = vperm.xlu1 %2197, %v2617_v39  }
 0x16f   :  { %2200 = vset.pattern.permute.xlu0 %v2502_v55 }
 0x170   :  { %588 = vperm.xlu0 %2200, %v2627_v43  }
 0x171   :  { %169 = vrot.lane.b32.xlu1 %v2627_v43, %s2499_s3 }
 0x172   :  { %2199 = vset.pattern.permute.xlu1 %v2501_v54 }
 0x174   :  { %2202 = vset.pattern.permute.xlu0 %v2496_v0 }
 0x175   :  { %898 = vperm.xlu0 %2202, %v2627_v43   ;;  %433 = vperm.xlu1 %2199, %v2627_v43  }
 0x179   :  { %2203 = vset.pattern.permute.xlu0 %v2500_v51  ;;  %2201 = vset.pattern.permute.xlu1 %v2503_v56 }
 0x17a   :  { %1053 = vperm.xlu0 %2203, %v2627_v43   ;;  %743 = vperm.xlu1 %2201, %v2627_v43  }
 0x17e   :  { %2205 = vset.pattern.permute.xlu0 %v2505_v58  ;;  %2204 = vset.pattern.permute.xlu1 %v2504_v57 }
 0x17f   :  { %1363 = vperm.xlu0 %2205, %v2627_v43   ;;  %1208 = vperm.xlu1 %2204, %v2627_v43  }
 0x183   :  { %237 = vrot.lane.b32.xlu0 %v224_v1, %s2506_s11 }
 0x184   :  { %2206 = vset.pattern.permute.xlu0 %v2497_v31 }
 0x19f   :  { %v172_v2 = vpop.permute.xlu1 %171 }
 0x1ac   :  { %v2724_v3 = vpop.permute.xlu0 %902 }
 0x1b0   :  { %v2726_v4 = vpop.permute.xlu1 %265 }
 0x1b1   :  { %v2728_v5 = vpop.permute.xlu0 %1057 }
 0x1b5   :  { %v2730_v6 = vpop.permute.xlu1 %437  ;;  %v168_v7 = vpop.permute.xlu0 %167 }
 0x1b6   :  { %179 = vxpose.xlu1.b32.start [1/4] (short) (narrow) %v168_v7, 8 }
 0x1ba   :  { %v2732_v8 = vpop.permute.xlu0 %429  ;;  %v2734_v9 = vpop.permute.xlu1 %592 }
 0x1bf   :  { %v2736_v10 = vpop.permute.xlu0 %739  ;;  %v2738_v11 = vpop.permute.xlu1 %747 }
 0x1c4   :  { %v2740_v12 = vpop.permute.xlu0 %894  ;;  %v2742_v13 = vpop.permute.xlu1 %1212 }
 0x1c9   :  { %v2744_v14 = vpop.permute.xlu0 %1049  ;;  %v2746_v15 = vpop.permute.xlu1 %1367 }
 0x1ce   :  { %v2748_v16 = vpop.permute.xlu0 %1204  ;;  %v2750_v17 = vpop.permute.xlu1 %257 }
 0x1d2   :  { %v174_v18 = vpop.permute.xlu0 %173 }
 0x1d3   :  { %v2752_v19 = vpop.permute.xlu1 %584 }
 0x1d6   :  { %v2754_v20 = vpop.permute.xlu0 %441 }
 0x1d8   :  { %v2756_v21 = vpop.permute.xlu1 %1359 }
 0x1db   :  { %v2758_v22 = vpop.permute.xlu0 %751 }
 0x1dd   :  { %v2760_v23 = vpop.permute.xlu1 %269 }
 0x1e0   :  { %v2762_v24 = vpop.permute.xlu0 %906 }
 0x1e2   :  { %v2764_v25 = vpop.permute.xlu1 %596 }
 0x1e5   :  { %v2766_v26 = vpop.permute.xlu0 %1216 }
 0x1e7   :  { %v2768_v27 = vpop.permute.xlu1 %1061 }
 0x1ea   :  { %v2770_v28 = vpop.permute.xlu0 %261 }
 0x1ec   :  { %v2772_v29 = vpop.permute.xlu1 %1371 }
 0x1ef   :  { %v2774_v30 = vpop.permute.xlu0 %588 }
 0x1f0   :  { %v170_v35 = vpop.permute.xlu1 %169 }
 0x1f1   :  { %180 = vxpose.xlu1.b32.cont [2/4] (short) (narrow) %v170_v35, 8 }
 0x1f4   :  { %v2776_v38 = vpop.permute.xlu0 %898 }
 0x1f5   :  { %181 = vxpose.xlu1.b32.cont [3/4] (short) (narrow) %v172_v2, 8 }
 0x1f9   :  { %v2778_v40 = vpop.permute.xlu0 %1053  ;;  %182 = vxpose.xlu1.b32.end [4/4] (short) (narrow) %v174_v18, 8 }
 0x1fe   :  { %v2780_v41 = vpop.permute.xlu0 %1363 }
 0x202   :  { %v238_v42 = vpop.permute.xlu0 %237 }
 0x203   :  { %v240_v44 = vadd.f32 %v238_v42, %v2612_v37  ;;  %v242_v45 = vadd.f32 %v2607_v36, %v238_v42  ;;  %v241_v52 = vadd.f32 %v238_v42, %v2627_v43  ;;  %v243_v59 = vadd.f32 %v2617_v39, %v238_v42 }
 0x204   :  { %v2804_v39 = vshrl.u32 %v225_v32, 7 }
 0x205   :  { %vm244_vm3 = vcmp.gt.f32.partialorder %v240_v44, 0.0  ;;  %v248_v47 = vmul.f32 0.2, %v240_v44  ;;  %v250_v48 = vmul.f32 0.2, %v242_v45  ;;  %vm246_vm4 = vcmp.gt.f32.partialorder %v242_v45, 0.0 }
 0x206   :  { %v249_v60 = vmul.f32 0.2, %v241_v52  ;;  %vm245_vm5 = vcmp.gt.f32.partialorder %v241_v52, 0.0  ;;  %v251_v61 = vmul.f32 0.2, %v243_v59  ;;  %vm247_vm6 = vcmp.gt.f32.partialorder %v243_v59, 0.0 }
 0x207   :  { %v252_v49 = vsel %vm244_vm3, %v240_v44, %v248_v47  ;;  %v254_v53 = vsel %vm246_vm4, %v242_v45, %v250_v48  ;;  %v601_v44 = vsub.s32 2, %v2804_v39  ;;  %vm340_vm4 = vcmask 261120  }
 0x208   :  { %294 = vperm.xlu0 %2206, %v252_v49   ;;  %v253_v62 = vsel %vm245_vm5, %v241_v52, %v249_v60  ;;  %v255_v36 = vsel %vm247_vm6, %v243_v59, %v251_v61 }
 0x20c   :  { %304 = vperm.xlu0 %2206, %v254_v53  }
 0x210   :  { %2209 = vset.pattern.permute.xlu0 %v2501_v54 }
 0x211   :  { %469 = vperm.xlu0 %2209, %v253_v62  }
 0x215   :  { %477 = vperm.xlu0 %2209, %v255_v36  }
 0x217   :  { %2207 = vset.pattern.permute.xlu1 %v2497_v31 }
 0x218   :  { %299 = vperm.xlu1 %2207, %v253_v62  }
 0x219   :  { %2210 = vset.pattern.permute.xlu0 %v2502_v55 }
 0x21a   :  { %620 = vperm.xlu0 %2210, %v252_v49  }
 0x21c   :  { %309 = vperm.xlu1 %2207, %v255_v36  }
 0x21e   :  { %628 = vperm.xlu0 %2210, %v254_v53  }
 0x220   :  { %2208 = vset.pattern.permute.xlu1 %v2501_v54 }
 0x221   :  { %465 = vperm.xlu1 %2208, %v252_v49  }
 0x222   :  { %2212 = vset.pattern.permute.xlu0 %v2503_v56  ;;  %v274_v56 = vsub.s32 0, %v2804_v39 }
 0x223   :  { %775 = vperm.xlu0 %2212, %v252_v49  }
 0x225   :  { %473 = vperm.xlu1 %2208, %v254_v53  }
 0x227   :  { %779 = vperm.xlu0 %2212, %v253_v62  }
 0x229   :  { %2211 = vset.pattern.permute.xlu1 %v2502_v55 }
 0x22a   :  { %624 = vperm.xlu1 %2211, %v253_v62  }
 0x22b   :  { %783 = vperm.xlu0 %2212, %v254_v53  }
 0x22e   :  { %632 = vperm.xlu1 %2211, %v255_v36  }
 0x22f   :  { %787 = vperm.xlu0 %2212, %v255_v36  }
 0x232   :  { %2215 = vset.pattern.permute.xlu1 %v2500_v51 }
 0x233   :  { %1089 = vperm.xlu1 %2215, %v253_v62   ;;  %2213 = vset.pattern.permute.xlu0 %v2496_v0  ;;  %v434_v0 = vpop.permute.xlu1 %433 }
 0x234   :  { %930 = vperm.xlu0 %2213, %v252_v49  }
 0x237   :  { %1097 = vperm.xlu1 %2215, %v255_v36   ;;  %v2801_v37 = vpop.permute.xlu1 %743 }
 0x238   :  { %934 = vperm.xlu0 %2213, %v253_v62  }
 0x23b   :  { %2217 = vset.pattern.permute.xlu1 %v2504_v57  ;;  %v2806_v43 = vpop.permute.xlu1 %1208 }
 0x23c   :  { %1244 = vperm.xlu1 %2217, %v253_v62   ;;  %938 = vperm.xlu0 %2213, %v254_v53  }
 0x240   :  { %1248 = vperm.xlu1 %2217, %v254_v53   ;;  %942 = vperm.xlu0 %2213, %v255_v36  }
 0x244   :  { %2218 = vset.pattern.permute.xlu1 %v2505_v58  ;;  %2214 = vset.pattern.permute.xlu0 %v2500_v51  ;;  %v1376_v51 = vsub.s32 7, %v2804_v39 }
 0x245   :  { %1395 = vperm.xlu1 %2218, %v252_v49   ;;  %1085 = vperm.xlu0 %2214, %v252_v49  }
 0x249   :  { %1403 = vperm.xlu1 %2218, %v254_v53   ;;  %1093 = vperm.xlu0 %2214, %v254_v53  }
 0x24d   :  { %1407 = vperm.xlu1 %2218, %v255_v36   ;;  %2216 = vset.pattern.permute.xlu0 %v2504_v57 }
 0x24e   :  { %1240 = vperm.xlu0 %2216, %v252_v49  }
 0x251   :  { %2220 = vset.pattern.permute.xlu1 %v2497_v31 }
 0x252   :  { %1252 = vperm.xlu0 %2216, %v255_v36  }
 0x256   :  { %2219 = vset.pattern.permute.xlu0 %v2505_v58  ;;  %v446_v58 = vsub.s32 1, %v2804_v39 }
 0x257   :  { %1399 = vperm.xlu0 %2219, %v253_v62  }
 0x25b   :  { %2221 = vset.pattern.permute.xlu0 %v2497_v31 }
 0x26d   :  { %v2809_v54 = vpop.trf.xlu1 }
 0x26e   :  { %v2812_v55 = vrot.slane %v2809_v54, %v1376_v51  ;;  %v275_v31 = vrot.slane %v2809_v54, %v274_v56  ;;  %v447_v1 = vrot.slane %v2809_v54, %v446_v58 }
 0x270   :  { %v276_v32 = vadd.f32 %v275_v31, %v2750_v17  ;;  %v278_v7 = vadd.f32 %v275_v31, %v2726_v4  ;;  %v277_v18 = vadd.f32 %v275_v31, %v2770_v28  ;;  %v449_v35 = vadd.f32 %v447_v1, %v434_v0 }
 0x271   :  { %v451_v48 = vadd.f32 %v447_v1, %v2754_v20  ;;  %v279_v52 = vadd.f32 %v275_v31, %v2760_v23  ;;  %v2829_v4 = vrot.slane %v2809_v54, %v601_v44  ;;  %v756_v28 = vsub.s32 3, %v2804_v39 }
 0x272   :  { %v284_v2 = vmul.f32 0.2, %v276_v32  ;;  %vm280_vm7 = vcmp.gt.f32.partialorder %v276_v32, 0.0  ;;  %v286_v47 = vmul.f32 0.2, %v278_v7  ;;  %vm282_vm8 = vcmp.gt.f32.partialorder %v278_v7, 0.0 }
 0x273   :  { %v285_v17 = vmul.f32 0.2, %v277_v18  ;;  %vm281_vm9 = vcmp.gt.f32.partialorder %v277_v18, 0.0  ;;  %vm453_vm10 = vcmp.gt.f32.partialorder %v449_v35, 0.0  ;;  %v457_v60 = vmul.f32 0.2, %v449_v35 }
 0x274   :  { %v288_v45 = vsel %vm280_vm7, %v276_v32, %v284_v2  ;;  %v290_v59 = vsel %vm282_vm8, %v278_v7, %v286_v47  ;;  %vm455_vm11 = vcmp.gt.f32.partialorder %v451_v48, 0.0  ;;  %v459_v61 = vmul.f32 0.2, %v451_v48 }
 0x275   :  { %v289_v36 = vsel %vm281_vm9, %v277_v18, %v285_v17  ;;  %v287_v51 = vmul.f32 0.2, %v279_v52  ;;  %vm283_vm12 = vcmp.gt.f32.partialorder %v279_v52, 0.0  ;;  %v448_v23 = vadd.f32 %v447_v1, %v2732_v8 }
 0x276   :  { %v603_v31 = vadd.f32 %v2829_v4, %v2752_v19  ;;  %v605_v58 = vadd.f32 %v2829_v4, %v2734_v9  ;;  %v461_v32 = vsel %vm453_vm10, %v449_v35, %v457_v60  ;;  %v463_v2 = vsel %vm455_vm11, %v451_v48, %v459_v61 }
 0x277   :  { %v450_v8 = vadd.f32 %v447_v1, %v2730_v6  ;;  %v456_v17 = vmul.f32 0.2, %v448_v23  ;;  %vm452_vm14 = vcmp.gt.f32.partialorder %v448_v23, 0.0  ;;  %v604_v6 = vadd.f32 %v2829_v4, %v2774_v30 }
 0x278   :  { %vm607_vm13 = vcmp.gt.f32.partialorder %v603_v31, 0.0  ;;  %v611_v9 = vmul.f32 0.2, %v603_v31  ;;  %vm609_vm15 = vcmp.gt.f32.partialorder %v605_v58, 0.0 }
 0x279   :  { %vm454_vm0 = vcmp.gt.f32.partialorder %v450_v8, 0.0  ;;  %v460_v61 = vsel %vm452_vm14, %v448_v23, %v456_v17  ;;  %vm608_vm3 = vcmp.gt.f32.partialorder %v604_v6, 0.0 }
 0x287   :  { %v295_v57 = vpop.permute.xlu0 %294 }
 0x288   :  { %v312_v49 = vsub.f32 %v288_v45, %v295_v57  ;;  %v291_v45 = vsel %vm283_vm12, %v279_v52, %v287_v51  ;;  %v458_v52 = vmul.f32 0.2, %v450_v8 }
 0x28a   :  { %v316_v62 = vmul.f32 1.442695, %v312_v49  ;;  %v462_v30 = vsel %vm454_vm0, %v450_v8, %v458_v52 }
 0x28b   :  { %v305_v63 = vpop.permute.xlu0 %304 }
 0x28c   :  { %v314_v20 = vsub.f32 %v290_v59, %v305_v63  ;;  %v757_v63 = vrot.slane %v2809_v54, %v756_v28  ;;  %2227 = vpow2.f32 %v316_v62  ;;  %v613_v59 = vmul.f32 0.2, %v605_v58 }
 0x28e   :  { %v320_v18 = vmul.f32 1.442695, %v314_v20  ;;  %v758_v60 = vadd.f32 %v757_v63, %v2736_v10  ;;  %v759_v28 = vadd.f32 %v757_v63, %v2801_v37  ;;  %v615_v20 = vsel %vm607_vm13, %v603_v31, %v611_v9 }
 0x28f   :  { %v911_v10 = vsub.s32 4, %v2804_v39  ;;  %v606_v31 = vadd.f32 %v2829_v4, %v2764_v25 }
 0x290   :  { %v470_v42 = vpop.permute.xlu0 %469  ;;  %vm762_vm1 = vcmp.gt.f32.partialorder %v758_v60, 0.0  ;;  %v766_v37 = vmul.f32 0.2, %v758_v60  ;;  %vm763_vm2 = vcmp.gt.f32.partialorder %v759_v28, 0.0  ;;  %v767_v51 = vmul.f32 0.2, %v759_v28 }
 0x291   :  { %v481_v49 = vsub.f32 %v461_v32, %v470_v42  ;;  %v2862_v17 = vrot.slane %v2809_v54, %v911_v10  ;;  %vm610_vm6 = vcmp.gt.f32.partialorder %v606_v31, 0.0 }
 0x293   :  { %v486_v1 = vmul.f32 1.442695, %v481_v49  ;;  %v770_v49 = vsel %vm762_vm1, %v758_v60, %v766_v37  ;;  %v913_v37 = vadd.f32 %v2862_v17, %v2740_v12 }
 0x294   :  { %v2826_v53 = vpop.permute.xlu0 %477 }
 0x295   :  { %v483_v42 = vsub.f32 %v463_v2, %v2826_v53  ;;  %vm917_vm8 = vcmp.gt.f32.partialorder %v913_v37, 0.0 }
 0x297   :  { %v300_v0 = vpop.permute.xlu1 %299  ;;  %v490_v53 = vmul.f32 1.442695, %v483_v42 }
 0x298   :  { %v313_v57 = vsub.f32 %v289_v36, %v300_v0  ;;  %v617_v36 = vsel %vm609_vm15, %v605_v58, %v613_v59  ;;  %v2228_v58 = vpop.eup %2227 }
 0x299   :  { %v2838_v44 = vpop.permute.xlu0 %620 }
 0x29a   :  { %v318_v7 = vmul.f32 1.442695, %v313_v57  ;;  %v635_v23 = vsub.f32 %v615_v20, %v2838_v44  ;;  %v760_v44 = vadd.f32 %v757_v63, %v2738_v11 }
 0x29b   :  { %v310_v47 = vpop.permute.xlu1 %309 }
 0x29c   :  { %2229 = vpow2.f32 %v318_v7  ;;  %v315_v19 = vsub.f32 %v291_v45, %v310_v47  ;;  %v612_v7 = vmul.f32 0.2, %v604_v6  ;;  %v2856_v47 = vld [vmem:[%s3216_s5] sm:$0xff]   ;;  %vm764_vm5 = vcmp.gt.f32.partialorder %v760_v44, 0.0 }
 0x29d   :  { %v629_v48 = vpop.permute.xlu0 %628  ;;  %2231 = vpow2.f32 %v320_v18 }
 0x29e   :  { %v322_v35 = vmul.f32 1.442695, %v315_v19  ;;  %v637_v18 = vsub.f32 %v617_v36, %v629_v48  ;;  %v771_v19 = vsel %vm763_vm2, %v759_v28, %v767_v51  ;;  %v616_v9 = vsel %vm608_vm3, %v604_v6, %v612_v7 }
 0x29f   :  { %v639_v48 = vmul.f32 1.442695, %v635_v23 }
 0x2a0   :  { %2233 = vpow2.f32 %v322_v35  ;;  %v466_v62 = vpop.permute.xlu1 %465  ;;  %v761_v35 = vadd.f32 %v757_v63, %v2758_v22  ;;  %v643_v60 = vmul.f32 1.442695, %v637_v18  ;;  %v768_v22 = vmul.f32 0.2, %v760_v44 }
 0x2a1   :  { %v480_v0 = vsub.f32 %v460_v61, %v466_v62  ;;  %2235 = vpow2.f32 %v486_v1  ;;  %v614_v1 = vmul.f32 0.2, %v606_v31  ;;  %v2870_v62 = vld [vmem:[%s3216_s5 + $0x8] sm:$0xff]  }
 0x2a2   :  { %v776_v32 = vpop.permute.xlu0 %775  ;;  %vm765_vm7 = vcmp.gt.f32.partialorder %v761_v35, 0.0  ;;  %v772_v23 = vsel %vm764_vm5, %v760_v44, %v768_v22 }
 0x2a3   :  { %v484_v57 = vmul.f32 1.442695, %v480_v0  ;;  %v790_v61 = vsub.f32 %v770_v49, %v776_v32  ;;  %v769_v0 = vmul.f32 0.2, %v761_v35  ;;  %v618_v32 = vsel %vm610_vm6, %v606_v31, %v614_v1 }
 0x2a4   :  { %v474_v2 = vpop.permute.xlu1 %473  ;;  %v914_v31 = vadd.f32 %v2862_v17, %v2776_v38 }
 0x2a5   :  { %2237 = vpow2.f32 %v484_v57  ;;  %v482_v45 = vsub.f32 %v462_v30, %v474_v2  ;;  %v794_v57 = vmul.f32 1.442695, %v790_v61 }
 0x2a6   :  { %v2230_v8 = vpop.eup %2229  ;;  %v780_v4 = vpop.permute.xlu0 %779  ;;  %2239 = vpow2.f32 %v490_v53  ;;  %vm918_vm9 = vcmp.gt.f32.partialorder %v914_v31, 0.0 }
 0x2a7   :  { %v488_v25 = vmul.f32 1.442695, %v482_v45  ;;  %v324_v59 = vpack.c.bf16 %v2230_v8, %v2228_v58  ;;  %v791_v52 = vsub.f32 %v771_v19, %v780_v4  ;;  %v2232_v42 = vpop.eup %2231  ;;  %v1066_v58 = vsub.s32 5, %v2804_v39 }
 0x2a8   :  { %v773_v45 = vsel %vm765_vm7, %v761_v35, %v769_v0  ;;  %v921_v8 = vmul.f32 0.2, %v913_v37 }
 0x2a9   :  { %2241 = vpow2.f32 %v488_v25  ;;  %v625_v28 = vpop.permute.xlu1 %624  ;;  %v338_v11 = vmul.bf16 %v2856_v47, %v324_v59  ;;  %v796_v63 = vmul.f32 1.442695, %v791_v52  ;;  %v2884_v59 = vrot.slane %v2809_v54, %v1066_v58 }
 0x2aa   :  { %v2234_v6 = vpop.eup %2233  ;;  %v636_v20 = vsub.f32 %v616_v9, %v625_v28  ;;  %v784_v36 = vpop.permute.xlu0 %783  ;;  %2243 = vpow2.f32 %v639_v48  ;;  %v915_v52 = vadd.f32 %v2862_v17, %v2724_v3  ;;  %v922_v28 = vmul.f32 0.2, %v914_v31 }
 0x2ab   :  { %2073 = vmatprep.mubr.msk.bf16.mxu1 %vm340_vm4, %v338_v11  ;;  %v325_v10 = vpack.c.bf16 %v2234_v6, %v2232_v42  ;;  %2245 = vpow2.f32 %v643_v60  ;;  %v2236_v53 = vpop.eup %2235  ;;  %v792_v49 = vsub.f32 %v772_v23, %v784_v36  ;;  %v925_v60 = vsel %vm917_vm8, %v913_v37, %v921_v8 }
 0x2ac   :  { %v641_v51 = vmul.f32 1.442695, %v636_v20  ;;  %v1069_v20 = vadd.f32 %v2884_v59, %v2778_v40  ;;  %v923_v0 = vmul.f32 0.2, %v915_v52  ;;  %vm919_vm10 = vcmp.gt.f32.partialorder %v915_v52, 0.0 }
 0x2ad   :  { %v633_v30 = vpop.permute.xlu1 %632  ;;  %v339_v7 = vmul.bf16 %v2870_v62, %v325_v10  ;;  %v798_v42 = vmul.f32 1.442695, %v792_v49  ;;  %v1071_v23 = vadd.f32 %v2884_v59, %v2768_v27 }
 0x2ae   :  { %2247 = vpow2.f32 %v641_v51  ;;  %v638_v2 = vsub.f32 %v618_v32, %v633_v30  ;;  %v788_v12 = vpop.permute.xlu0 %787  ;;  %v926_v51 = vsel %vm918_vm9, %v914_v31, %v922_v28  ;;  %v916_v32 = vadd.f32 %v2862_v17, %v2762_v24 }
 0x2af   :  { %v2238_v18 = vpop.eup %2237  ;;  %2249 = vpow2.f32 %v796_v63  ;;  %2074 = vmatmul.mubr.msk.bf16.vlgmr.msra.gmra.mrb[0].mxu1 %vm340_vm4, %v339_v7  ;;  %v793_v25 = vsub.f32 %v773_v45, %v788_v12  ;;  %v1221_v63 = vsub.s32 6, %v2804_v39  ;;  %vm1073_vm11 = vcmp.gt.f32.partialorder %v1069_v20, 0.0 }
 0x2b0   :  { %v645_v19 = vmul.f32 1.442695, %v638_v2  ;;  %2078 = vmatpush3.bf16.msra.mxu1 %v2640_v50  ;;  %v492_v4 = vpack.c.bf16 %v2236_v53, %v2238_v18  ;;  %2251 = vpow2.f32 %v794_v57  ;;  %v2240_v44 = vpop.eup %2239  ;;  %v1077_v53 = vmul.f32 0.2, %v1069_v20 }
 0x2b1   :  { %2079 = vmatprep.subr.bf16.mxu1 %v2633_v46  ;;  %v800_v9 = vmul.f32 1.442695, %v793_v25  ;;  %v2908_v2 = vrot.slane %v2809_v54, %v1221_v63  ;;  %v1068_v17 = vadd.f32 %v2884_v59, %v2744_v14  ;;  %v927_v8 = vsel %vm919_vm10, %v915_v52, %v923_v0 }
 0x2b2   :  { %2253 = vpow2.f32 %v645_v19  ;;  %v2886_v35 = vpop.permute.xlu1 %1089  ;;  %v494_v38 = vmul.bf16 %v2856_v47, %v492_v4  ;;  %v924_v27 = vmul.f32 0.2, %v916_v32  ;;  %vm920_vm12 = vcmp.gt.f32.partialorder %v916_v32, 0.0 }
 0x2b3   :  { %v2242_v48 = vpop.eup %2241  ;;  %v931_v61 = vpop.permute.xlu0 %930  ;;  %2255 = vpow2.f32 %v800_v9  ;;  %v1081_v25 = vsel %vm1073_vm11, %v1069_v20, %v1077_v53  ;;  %v1079_v4 = vmul.f32 0.2, %v1071_v23  ;;  %vm1075_vm13 = vcmp.gt.f32.partialorder %v1071_v23, 0.0 }
 0x2b4   :  { %v493_v1 = vpack.c.bf16 %v2240_v44, %v2242_v48  ;;  %2080 = vmatpush3.bf16.msra.mxu1 %v2633_v46  ;;  %2081 = vmatprep.mubr.msk.bf16.mxu1 %vm340_vm4, %v494_v38  ;;  %v945_v11 = vsub.f32 %v925_v60, %v931_v61  ;;  %v2244_v6 = vpop.eup %2243  ;;  %2257 = vpow2.f32 %v798_v42  ;;  %v1224_v14 = vadd.f32 %v2908_v2, %v2806_v43 }
 0x2b5   :  { %2085 = vmatprep.subr.bf16.mxu1 %v2640_v50  ;;  %v2246_v36 = vpop.eup %2245  ;;  %v1076_v38 = vmul.f32 0.2, %v1068_v17  ;;  %v1070_v61 = vadd.f32 %v2884_v59, %v2728_v5  ;;  %v1101_v28 = vsub.f32 %v1081_v25, %v2886_v35  ;;  %vm1072_vm14 = vcmp.gt.f32.partialorder %v1068_v17, 0.0 }
 0x2b6   :  { %v2896_v22 = vpop.permute.xlu1 %1097  ;;  %v495_v3 = vmul.bf16 %v2870_v62, %v493_v1  ;;  %v949_v37 = vmul.f32 1.442695, %v945_v11  ;;  %v928_v1 = vsel %vm920_vm12, %v916_v32, %v924_v27  ;;  %v1225_v20 = vadd.f32 %v2908_v2, %v2742_v13 }
 0x2b7   :  { %v935_v57 = vpop.permute.xlu0 %934  ;;  %vm1228_vm15 = vcmp.gt.f32.partialorder %v1224_v14, 0.0  ;;  %v1232_v63 = vmul.f32 0.2, %v1224_v14  ;;  %v1080_v59 = vsel %vm1072_vm14, %v1068_v17, %v1076_v38  ;;  %vm1074_vm0 = vcmp.gt.f32.partialorder %v1070_v61, 0.0 }
 0x2b8   :  { %v2248_v10 = vpop.eup %2247  ;;  %2082 = vmatmul.mubr.msk.bf16.vlgmr.msra.gmra.mrb[4].mxu1 %vm340_vm4, %v495_v3  ;;  %v946_v40 = vsub.f32 %v926_v51, %v935_v57  ;;  %2259 = vpow2.f32 %v949_v37  ;;  %v1106_v0 = vmul.f32 1.442695, %v1101_v28  ;;  %v1223_v37 = vadd.f32 %v2908_v2, %v2748_v16 }
 0x2b9   :  { %v2250_v30 = vpop.eup %2249  ;;  %2086 = vmatpush3.bf16.msra.mxu1 %v2640_v50  ;;  %v647_v7 = vpack.c.bf16 %v2248_v10, %v2244_v6  ;;  %v1083_v6 = vsel %vm1075_vm13, %v1071_v23, %v1079_v4  ;;  %vm1229_vm1 = vcmp.gt.f32.partialorder %v1225_v20, 0.0  ;;  %v1233_v57 = vmul.f32 0.2, %v1225_v20 }
 0x2ba   :  { %2087 = vmatprep.subr.bf16.mxu1 %v2633_v46  ;;  %v2252_v58 = vpop.eup %2251  ;;  %v951_v18 = vmul.f32 1.442695, %v946_v40  ;;  %v1103_v10 = vsub.f32 %v1083_v6, %v2896_v22  ;;  %v1236_v40 = vsel %vm1228_vm15, %v1224_v14, %v1232_v63  ;;  %v1380_v22 = vadd.f32 %v2812_v55, %v2746_v15 }
 0x2bb   :  { %v2910_v45 = vpop.permute.xlu1 %1244  ;;  %v649_v24 = vmul.bf16 %v2856_v47, %v647_v7  ;;  %v939_v31 = vpop.permute.xlu0 %938  ;;  %v802_v49 = vpack.c.bf16 %v2250_v30, %v2252_v58  ;;  %v1378_v7 = vadd.f32 %v2812_v55, %v2756_v21  ;;  %v1231_v21 = vmul.f32 0.2, %v1223_v37 }
 0x2bc   :  { %v2254_v12 = vpop.eup %2253  ;;  %2261 = vpow2.f32 %v951_v18  ;;  %v947_v54 = vsub.f32 %v927_v8, %v939_v31  ;;  %v1110_v17 = vmul.f32 1.442695, %v1103_v10  ;;  %v1226_v15 = vadd.f32 %v2908_v2, %v2766_v26 }
 0x2bd   :  { %v648_v19 = vpack.c.bf16 %v2254_v12, %v2246_v36  ;;  %2088 = vmatpush3.bf16.msra.mxu1 %v2633_v46  ;;  %2089 = vmatprep.mubr.msk.bf16.mxu1 %vm340_vm4, %v649_v24  ;;  %v2256_v48 = vpop.eup %2255  ;;  %v804_v60 = vmul.bf16 %v2856_v47, %v802_v49  ;;  %v1078_v36 = vmul.f32 0.2, %v1070_v61  ;;  %v1381_v24 = vadd.f32 %v2812_v55, %v2772_v29 }
 0x2be   :  { %2093 = vmatprep.subr.bf16.mxu1 %v2640_v50  ;;  %v953_v52 = vmul.f32 1.442695, %v947_v54  ;;  %v2258_v43 = vpop.eup %2257  ;;  %v1256_v8 = vsub.f32 %v1236_v40, %v2910_v45  ;;  %vm1382_vm2 = vcmp.gt.f32.partialorder %v1378_v7, 0.0  ;;  %v1386_v49 = vmul.f32 0.2, %v1378_v7 }
 0x2bf   :  { %v2921_v44 = vpop.permute.xlu1 %1248  ;;  %v650_v9 = vmul.bf16 %v2870_v62, %v648_v19  ;;  %v943_v42 = vpop.permute.xlu0 %942  ;;  %v803_v3 = vpack.c.bf16 %v2256_v48, %v2258_v43  ;;  %v1082_v23 = vsel %vm1074_vm0, %v1070_v61, %v1078_v36  ;;  %vm1384_vm3 = vcmp.gt.f32.partialorder %v1380_v22, 0.0 }
 0x2c0   :  { %v948_v11 = vsub.f32 %v928_v1, %v943_v42  ;;  %2263 = vpow2.f32 %v953_v52  ;;  %vm1227_vm5 = vcmp.gt.f32.partialorder %v1223_v37, 0.0  ;;  %v1237_v29 = vsel %vm1229_vm1, %v1225_v20, %v1233_v57 }
 0x2c1   :  { %2090 = vmatmul.mubr.msk.bf16.vlgmr.msra.gmra.mrb[8].mxu1 %vm340_vm4, %v650_v9  ;;  %v805_v53 = vmul.bf16 %v2870_v62, %v803_v3  ;;  %v1388_v54 = vmul.f32 0.2, %v1380_v22  ;;  %v1389_v26 = vmul.f32 0.2, %v1381_v24  ;;  %vm1385_vm6 = vcmp.gt.f32.partialorder %v1381_v24, 0.0 }
 0x2c2   :  { %2094 = vmatpush3.bf16.msra.mxu1 %v2640_v50  ;;  %2097 = vmatprep.mubr.msk.bf16.mxu1 %vm340_vm4, %v804_v60  ;;  %v955_v5 = vmul.f32 1.442695, %v948_v11  ;;  %v2260_v51 = vpop.eup %2259  ;;  %vm1230_vm7 = vcmp.gt.f32.partialorder %v1226_v15, 0.0  ;;  %v1234_v2 = vmul.f32 0.2, %v1226_v15  ;;  %v1257_v4 = vsub.f32 %v1237_v29, %v2921_v44 }
 0x2c3   :  { %2095 = vmatprep.subr.bf16.mxu1 %v2633_v46  ;;  %v1261_v25 = vmul.f32 1.442695, %v1256_v8  ;;  %v1235_v9 = vsel %vm1227_vm5, %v1223_v37, %v1231_v21  ;;  %v1379_v1 = vadd.f32 %v2812_v55, %v2780_v41  ;;  %v1390_v60 = vsel %vm1382_vm2, %v1378_v7, %v1386_v49 }
 0x2c4   :  { %v2935_v35 = vpop.permute.xlu1 %1395  ;;  %2265 = vpow2.f32 %v955_v5  ;;  %v1086_v13 = vpop.permute.xlu0 %1085  ;;  %v1393_v61 = vsel %vm1385_vm6, %v1381_v24, %v1389_v26  ;;  %v1392_v44 = vsel %vm1384_vm3, %v1380_v22, %v1388_v54  ;;  %v1238_v43 = vsel %vm1230_vm7, %v1226_v15, %v1234_v2 }
 0x2c5   :  { %v1100_v32 = vsub.f32 %v1080_v59, %v1086_v13  ;;  %2267 = vpow2.f32 %v1106_v0  ;;  %v1263_v6 = vmul.f32 1.442695, %v1257_v4  ;;  %v1410_v20 = vsub.f32 %v1390_v60, %v2935_v35 }
 0x2c6   :  { %2096 = vmatpush3.bf16.msra.mxu1 %v2633_v46  ;;  %v2262_v30 = vpop.eup %2261  ;;  %v1387_v59 = vmul.f32 0.2, %v1379_v1  ;;  %vm1383_vm8 = vcmp.gt.f32.partialorder %v1379_v1, 0.0  ;;  %vm1513_vm9 = vcmask 64512   ;;  %vm1518_vm10 = vcmask 130048  }
 0x2c7   :  { %2109 = vmatprep.subr.bf16.mxu1 %v2640_v50  ;;  %v1104_v16 = vmul.f32 1.442695, %v1100_v32  ;;  %v957_v18 = vpack.c.bf16 %v2262_v30, %v2260_v51  ;;  %v1414_v35 = vmul.f32 1.442695, %v1410_v20  ;;  %vm1523_vm11 = vcmask 195584  }
 0x2c8   :  { %v2949_v58 = vpop.permute.xlu1 %1403  ;;  %v1094_v12 = vpop.permute.xlu0 %1093  ;;  %v1391_v57 = vsel %vm1383_vm8, %v1379_v1, %v1387_v59  ;;  %vm1532_vm12 = vcmask 326656   ;;  %vm1537_vm13 = vcmask 392192   ;;  %vm1542_vm14 = vcmask 457728  }
 0x2c9   :  { %2098 = vmatmul.mubr.msk.bf16.vlgmr.msra.gmra.mrb[12].mxu1 %vm340_vm4, %v805_v53  ;;  %2269 = vpow2.f32 %v1104_v16  ;;  %v1102_v31 = vsub.f32 %v1082_v23, %v1094_v12  ;;  %v959_v27 = vmul.bf16 %v2856_v47, %v957_v18  ;;  %v1412_v41 = vsub.f32 %v1392_v44, %v2949_v58 }
 0x2ca   :  { %2110 = vmatpush3.bf16.msra.mxu1 %v2640_v50  ;;  %2271 = vpow2.f32 %v1110_v17  ;;  %v2264_v45 = vpop.eup %2263  ;;  %vm1579_vm1 = vcmask 523264   ;;  %vm1698_vm5 = vcmp.eq.s32.totalorder %v2602_v33, 4  ;;  %vm1683_vm6 = vcmask 1048568  }
 0x2cb   :  { %2111 = vmatprep.subr.bf16.mxu1 %v2633_v46  ;;  %v1108_v19 = vmul.f32 1.442695, %v1102_v31  ;;  %2105 = vmatprep.mubr.msk.bf16.mxu0 %vm340_vm4, %v959_v27  ;;  %v1418_v51 = vmul.f32 1.442695, %v1412_v41  ;;  %vm1697_vm7 = vcmp.lt.s32.totalorder %v2602_v33, 4 }
 0x2cc   :  { %v1408_v14 = vpop.permute.xlu1 %1407 }
 0x2cd   :  { %2273 = vpow2.f32 %v1108_v19  ;;  %v1241_v38 = vpop.permute.xlu0 %1240  ;;  %v1413_v28 = vsub.f32 %v1393_v61, %v1408_v14 }
 0x2ce   :  { %2112 = vmatpush3.bf16.msra.mxu1 %v2633_v46  ;;  %v2266_v48 = vpop.eup %2265  ;;  %v1255_v52 = vsub.f32 %v1235_v9, %v1241_v38  ;;  %2275 = vpow2.f32 %v1261_v25 }
 0x2cf   :  { %2125 = vmatprep.subr.bf16.mxu1 %v2640_v50  ;;  %v958_v42 = vpack.c.bf16 %v2266_v48, %v2264_v45  ;;  %v2268_v5 = vpop.eup %2267  ;;  %v1420_v0 = vmul.f32 1.442695, %v1413_v28 }
 0x2d0   :  { %v1259_v11 = vmul.f32 1.442695, %v1255_v52 }
 0x2d1   :  { %v1253_v3 = vpop.permute.xlu0 %1252  ;;  %v960_v63 = vmul.bf16 %v2870_v62, %v958_v42 }
 0x2d2   :  { %2277 = vpow2.f32 %v1259_v11  ;;  %v1258_v55 = vsub.f32 %v1238_v43, %v1253_v3 }
 0x2d3   :  { %v2270_v36 = vpop.eup %2269  ;;  %2106 = vmatmul.mubr.msk.bf16.vlgmr.msra.gmra.mrb[4].mxu0 %vm340_vm4, %v960_v63  ;;  %2279 = vpow2.f32 %v1263_v6 }
 0x2d4   :  { %v1265_v10 = vmul.f32 1.442695, %v1258_v55  ;;  %2118 = vmatpush3.bf16.msra.mxu0 %v2640_v50  ;;  %v1112_v13 = vpack.c.bf16 %v2268_v5, %v2270_v36  ;;  %v2272_v37 = vpop.eup %2271 }
 0x2d5   :  { %2119 = vmatprep.subr.bf16.mxu0 %v2633_v46 }
 0x2d6   :  { %2281 = vpow2.f32 %v1265_v10  ;;  %v1400_v32 = vpop.permute.xlu0 %1399  ;;  %v1114_v30 = vmul.bf16 %v2856_v47, %v1112_v13 }
 0x2d7   :  { %v2274_v40 = vpop.eup %2273  ;;  %v1411_v7 = vsub.f32 %v1391_v57, %v1400_v32  ;;  %2283 = vpow2.f32 %v1420_v0 }
 0x2d8   :  { %v1113_v22 = vpack.c.bf16 %v2272_v37, %v2274_v40  ;;  %2120 = vmatpush3.bf16.msra.mxu0 %v2633_v46  ;;  %2113 = vmatprep.mubr.msk.bf16.mxu1 %vm340_vm4, %v1114_v30  ;;  %2285 = vpow2.f32 %v1414_v35  ;;  %v2276_v23 = vpop.eup %2275 }
 0x2d9   :  { %v1416_v53 = vmul.f32 1.442695, %v1411_v7  ;;  %2287 = vpow2.f32 %v1418_v51 }
 0x2da   :  { %v1115_v16 = vmul.bf16 %v2870_v62, %v1113_v22 }
 0x2db   :  { %2289 = vpow2.f32 %v1416_v53 }
 0x2dc   :  { %v2278_v58 = vpop.eup %2277  ;;  %2114 = vmatmul.mubr.msk.bf16.vlgmr.msra.gmra.mrb[16].mxu1 %vm340_vm4, %v1115_v16 }
 0x2dd   :  { %2126 = vmatpush3.bf16.msra.mxu1 %v2640_v50  ;;  %v1267_v18 = vpack.c.bf16 %v2276_v23, %v2278_v58  ;;  %v2280_v24 = vpop.eup %2279 }
 0x2de   :  { %2127 = vmatprep.subr.bf16.mxu1 %v2633_v46 }
 0x2df   :  { %v1269_v17 = vmul.bf16 %v2856_v47, %v1267_v18 }
 0x2e0   :  { %v2282_v12 = vpop.eup %2281 }
 0x2e1   :  { %v1268_v21 = vpack.c.bf16 %v2282_v12, %v2280_v24  ;;  %2128 = vmatpush3.bf16.msra.mxu1 %v2633_v46  ;;  %2121 = vmatprep.mubr.msk.bf16.mxu0 %vm340_vm4, %v1269_v17  ;;  %v2284_v15 = vpop.eup %2283 }
 0x2e2   :  { %v2286_v8 = vpop.eup %2285 }
 0x2e3   :  { %v1270_v31 = vmul.bf16 %v2870_v62, %v1268_v21  ;;  %v2288_v27 = vpop.eup %2287 }
 0x2e4   :  { %v1423_v29 = vpack.c.bf16 %v2284_v15, %v2288_v27 }
 0x2e5   :  { %v2290_v49 = vpop.eup %2289  ;;  %2122 = vmatmul.mubr.msk.bf16.vlgmr.msra.gmra.mrb[8].mxu0 %vm340_vm4, %v1270_v31 }
 0x2e6   :  { %v1422_v50 = vpack.c.bf16 %v2290_v49, %v2286_v8  ;;  %v1425_v54 = vmul.bf16 %v2870_v62, %v1423_v29 }
 0x2e8   :  { %v1424_v19 = vmul.bf16 %v2856_v47, %v1422_v50 }
 0x2ea   :  { %2129 = vmatprep.mubr.msk.bf16.mxu1 %vm340_vm4, %v1424_v19 }
 0x2eb   :  { %2130 = vmatmul.mubr.msk.bf16.vlgmr.msra.gmra.mrb[20].mxu1 %vm340_vm4, %v1425_v54 }
 0x382   :  { %v2993_v46 = vpop.f32.mrb[0].mxu1 }
 0x383   :  { %v398_v26 = vmax.f32 %v2993_v46, 1e-12  ;;  %v2996_v2 = vpop.f32.mrb[1].mxu1 }
 0x384   :  { %v396_v45 = vmax.f32 %v2996_v2, 1e-12  ;;  %v2999_v25 = vpop.f32.mrb[2].mxu1 }
 0x385   :  { %2291 = vrcp.f32 %v398_v26  ;;  %v3001_v4 = vpop.f32.mrb[3].mxu1  ;;  %v399_v47 = vmax.f32 %v2999_v25, 1e-12 }
 0x386   :  { %2293 = vrcp.f32 %v396_v45  ;;  %v397_v0 = vmax.f32 %v3001_v4, 1e-12 }
 0x387   :  { %2295 = vrcp.f32 %v399_v47 }
 0x38b   :  { %v3004_v62 = vpop.f32.mrb[4].mxu1 }
 0x38c   :  { %v3006_v14 = vpop.f32.mrb[5].mxu1  ;;  %v553_v37 = vmax.f32 %v3004_v62, 1e-12 }
 0x38d   :  { %v3008_v9 = vpop.f32.mrb[6].mxu1  ;;  %v551_v18 = vmax.f32 %v3006_v14, 1e-12 }
 0x38e   :  { %v3010_v38 = vpop.f32.mrb[7].mxu1  ;;  %v554_v10 = vmax.f32 %v3008_v9, 1e-12 }
 0x38f   :  { %v2292_v48 = vpop.eup %2291  ;;  %v552_v21 = vmax.f32 %v3010_v38, 1e-12 }
 0x390   :  { %v2294_v52 = vpop.eup %2293  ;;  %416 = vperm.xlu1 %2220, %v2292_v48  }
 0x391   :  { %406 = vperm.xlu0 %2221, %v2294_v52   ;;  %v2296_v1 = vpop.eup %2295 }
 0x394   :  { %v3012_v42 = vpop.f32.mrb[8].mxu1 }
 0x395   :  { %421 = vperm.xlu0 %2221, %v2296_v1   ;;  %v3014_v60 = vpop.f32.mrb[9].mxu1  ;;  %v708_v19 = vmax.f32 %v3012_v42, 1e-12 }
 0x396   :  { %v3016_v61 = vpop.f32.mrb[10].mxu1  ;;  %v706_v47 = vmax.f32 %v3014_v60, 1e-12 }
 0x397   :  { %v3018_v44 = vpop.f32.mrb[11].mxu1  ;;  %v709_v26 = vmax.f32 %v3016_v61, 1e-12 }
 0x398   :  { %v707_v52 = vmax.f32 %v3018_v44, 1e-12 }
 0x39c   :  { %v3020_v28 = vpop.f32.mrb[12].mxu1 }
 0x39d   :  { %v3022_v11 = vpop.f32.mrb[13].mxu1 }
 0x39e   :  { %v3024_v43 = vpop.f32.mrb[14].mxu1 }
 0x39f   :  { %v3026_v6 = vpop.f32.mrb[15].mxu1 }
 0x3a6   :  { %v3028_v20 = vpop.f32.mrb[4].mxu0 }
 0x3a7   :  { %v1018_v3 = vmax.f32 %v3028_v20, 1e-12  ;;  %v3031_v63 = vpop.f32.mrb[5].mxu0 }
 0x3a8   :  { %v3033_v5 = vpop.f32.mrb[6].mxu0  ;;  %v1016_v41 = vmax.f32 %v3031_v63, 1e-12 }
 0x3a9   :  { %2297 = vrcp.f32 %v1018_v3  ;;  %v1019_v55 = vmax.f32 %v3033_v5, 1e-12  ;;  %v3037_v59 = vpop.f32.mrb[7].mxu0  ;;  %v863_v3 = vmax.f32 %v3020_v28, 1e-12 }
 0x3aa   :  { %v1017_v36 = vmax.f32 %v3037_v59, 1e-12 }
 0x3ab   :  { %2299 = vrcp.f32 %v1019_v55  ;;  %v864_v55 = vmax.f32 %v3024_v43, 1e-12 }
 0x3ac   :  { %2301 = vrcp.f32 %v1016_v41 }
 0x3ad   :  { %2303 = vrcp.f32 %v1017_v36 }
 0x3ae   :  { %2305 = vrcp.f32 %v397_v0  ;;  %v861_v0 = vmax.f32 %v3022_v11, 1e-12 }
 0x3af   :  { %v3042_v13 = vpop.f32.mrb[16].mxu1  ;;  %2307 = vrcp.f32 %v554_v10 }
 0x3b0   :  { %v3044_v35 = vpop.f32.mrb[17].mxu1  ;;  %2309 = vrcp.f32 %v553_v37  ;;  %v862_v37 = vmax.f32 %v3026_v6, 1e-12 }
 0x3b1   :  { %v3047_v51 = vpop.f32.mrb[18].mxu1 }
 0x3b2   :  { %v3049_v57 = vpop.f32.mrb[19].mxu1 }
 0x3b3   :  { %v2298_v32 = vpop.eup %2297 }
 0x3b4   :  { %1036 = vperm.xlu1 %2220, %v2298_v32  }
 0x3b5   :  { %v2300_v30 = vpop.eup %2299 }
 0x3b6   :  { %1041 = vperm.xlu0 %2221, %v2300_v30   ;;  %v2302_v40 = vpop.eup %2301  ;;  %v1173_v30 = vmax.f32 %v3042_v13, 1e-12 }
 0x3b7   :  { %v2304_v22 = vpop.eup %2303 }
 0x3b8   :  { %v3051_v7 = vpop.f32.mrb[8].mxu0  ;;  %1026 = vperm.xlu1 %2220, %v2302_v40   ;;  %v2306_v58 = vpop.eup %2305 }
 0x3b9   :  { %v1328_v53 = vmax.f32 %v3051_v7, 1e-12  ;;  %v3054_v16 = vpop.f32.mrb[9].mxu0  ;;  %v2308_v12 = vpop.eup %2307 }
 0x3ba   :  { %v3056_v23 = vpop.f32.mrb[10].mxu0  ;;  %1031 = vperm.xlu0 %2221, %v2304_v22   ;;  %v2310_v8 = vpop.eup %2309  ;;  %v1326_v31 = vmax.f32 %v3054_v16, 1e-12  ;;  %v1174_v22 = vmax.f32 %v3047_v51, 1e-12 }
 0x3bb   :  { %2311 = vrcp.f32 %v1328_v53  ;;  %v1329_v24 = vmax.f32 %v3056_v23, 1e-12  ;;  %v3060_v17 = vpop.f32.mrb[11].mxu0 }
 0x3bc   :  { %411 = vperm.xlu1 %2220, %v2306_v58   ;;  %v1327_v29 = vmax.f32 %v3060_v17, 1e-12  ;;  %v1171_v58 = vmax.f32 %v3044_v35, 1e-12 }
 0x3bd   :  { %2313 = vrcp.f32 %v1329_v24  ;;  %v1172_v24 = vmax.f32 %v3049_v57, 1e-12 }
 0x3be   :  { %576 = vperm.xlu0 %2221, %v2308_v12   ;;  %v3063_v15 = vpop.f32.mrb[20].mxu1  ;;  %2315 = vrcp.f32 %v551_v18 }
 0x3bf   :  { %v3066_v27 = vpop.f32.mrb[21].mxu1  ;;  %2317 = vrcp.f32 %v552_v21 }
 0x3c0   :  { %v3068_v49 = vpop.f32.mrb[22].mxu1  ;;  %571 = vperm.xlu1 %2220, %v2310_v8   ;;  %2319 = vrcp.f32 %v1326_v31  ;;  %v1481_v21 = vmax.f32 %v3066_v27, 1e-12 }
 0x3c1   :  { %v3071_v50 = vpop.f32.mrb[23].mxu1  ;;  %2321 = vrcp.f32 %v1327_v29 }
 0x3c2   :  { %2323 = vrcp.f32 %v708_v19  ;;  %v1482_v31 = vmax.f32 %v3071_v50, 1e-12  ;;  %v1483_v19 = vmax.f32 %v3063_v15, 1e-12 }
 0x3c3   :  { %2325 = vrcp.f32 %v709_v26  ;;  %v1484_v26 = vmax.f32 %v3068_v49, 1e-12 }
 0x3c4   :  { %2327 = vrcp.f32 %v706_v47 }
 0x3c5   :  { %v2312_v54 = vpop.eup %2311  ;;  %2329 = vrcp.f32 %v707_v52 }
 0x3c6   :  { %1346 = vperm.xlu1 %2220, %v2312_v54   ;;  %2331 = vrcp.f32 %v863_v3 }
 0x3c7   :  { %v2314_v45 = vpop.eup %2313  ;;  %2333 = vrcp.f32 %v864_v55  ;;  %v101_v55 = vld [vmem:[#allocation7] sm:$0xff] }
 0x3c8   :  { %1351 = vperm.xlu0 %2221, %v2314_v45   ;;  %v2316_v48 = vpop.eup %2315  ;;  %2335 = vrcp.f32 %v861_v0  ;;  %v103_v0 = vld [vmem:[#allocation7 + $0x10] sm:$0xff] }
 0x3c9   :  { %v2318_v1 = vpop.eup %2317  ;;  %2337 = vrcp.f32 %v862_v37  ;;  %v104_v37 = vld [vmem:[#allocation7 + $0x18] sm:$0xff] }
 0x3ca   :  { %561 = vperm.xlu1 %2220, %v2316_v48   ;;  %v2320_v41 = vpop.eup %2319  ;;  %2339 = vrcp.f32 %v1173_v30  ;;  %v105_v30 = vld [vmem:[#allocation7 + $0x20] sm:$0xff] }
 0x3cb   :  { %v2322_v36 = vpop.eup %2321  ;;  %2341 = vrcp.f32 %v1174_v22 }
 0x3cc   :  { %566 = vperm.xlu0 %2221, %v2318_v1   ;;  %v2324_v10 = vpop.eup %2323  ;;  %2343 = vrcp.f32 %v1171_v58  ;;  %v108_v58 = vld [vmem:[#allocation7 + $0x38] sm:$0xff] }
 0x3cd   :  { %v2326_v32 = vpop.eup %2325  ;;  %2345 = vrcp.f32 %v1172_v24 }
 0x3ce   :  { %1336 = vperm.xlu1 %2220, %v2320_v41   ;;  %v2328_v40 = vpop.eup %2327  ;;  %2347 = vrcp.f32 %v1481_v21 }
 0x3cf   :  { %v2330_v53 = vpop.eup %2329  ;;  %2349 = vrcp.f32 %v1482_v31 }
 0x3d0   :  { %1341 = vperm.xlu0 %2221, %v2322_v36   ;;  %v2332_v18 = vpop.eup %2331  ;;  %2351 = vrcp.f32 %v1483_v19  ;;  %v102_v36 = vld [vmem:[#allocation7 + $0x8] sm:$0xff] }
 0x3d1   :  { %v2334_v12 = vpop.eup %2333  ;;  %2353 = vrcp.f32 %v1484_v26 }
 0x3d2   :  { %726 = vperm.xlu1 %2220, %v2324_v10   ;;  %v2336_v8 = vpop.eup %2335  ;;  %v109_v10 = vpack.c.bf16 %v102_v36, %v101_v55 }
 0x3d3   :  { %v2338_v29 = vpop.eup %2337 }
 0x3d4   :  { %731 = vperm.xlu0 %2221, %v2326_v32   ;;  %v2340_v54 = vpop.eup %2339  ;;  %v110_v32 = vpack.c.bf16 %v104_v37, %v103_v0  ;;  %2133 = vmatprep.subr.bf16.mxu0 %v109_v10 }
 0x3d5   :  { %v2342_v45 = vpop.eup %2341  ;;  %2134 = vmatpush3.bf16.msra.mxu0 %v109_v10 }
 0x3d6   :  { %716 = vperm.xlu1 %2220, %v2328_v40   ;;  %v2344_v47 = vpop.eup %2343  ;;  %v106_v40 = vld [vmem:[#allocation7 + $0x28] sm:$0xff]  ;;  %2135 = vmatprep.subr.bf16.mxu0 %v110_v32 }
 0x3d7   :  { %v2346_v48 = vpop.eup %2345  ;;  %v111_v22 = vpack.c.bf16 %v106_v40, %v105_v30 }
 0x3d8   :  { %721 = vperm.xlu0 %2221, %v2330_v53   ;;  %v2348_v52 = vpop.eup %2347  ;;  %v107_v53 = vld [vmem:[#allocation7 + $0x30] sm:$0xff] }
 0x3d9   :  { %v2350_v1 = vpop.eup %2349  ;;  %2136 = vmatpush3.bf16.msra.mxu0 %v110_v32 }
 0x3da   :  { %881 = vperm.xlu1 %2220, %v2332_v18   ;;  %v2352_v3 = vpop.eup %2351  ;;  %2137 = vmatprep.subr.bf16.mxu0 %v111_v22  ;;  %v112_v18 = vpack.c.bf16 %v108_v58, %v107_v53 }
 0x3db   :  { %v2354_v41 = vpop.eup %2353 }
 0x3dc   :  { %886 = vperm.xlu0 %2221, %v2334_v12  }
 0x3dd   :  { %2138 = vmatpush3.bf16.msra.mxu0 %v111_v22 }
 0x3de   :  { %871 = vperm.xlu1 %2220, %v2336_v8   ;;  %2139 = vmatprep.subr.bf16.mxu0 %v112_v18 }
 0x3e0   :  { %876 = vperm.xlu0 %2221, %v2338_v29  }
 0x3e1   :  { %2140 = vmatpush3.bf16.msra.mxu0 %v112_v18 }
 0x3e2   :  { %1191 = vperm.xlu1 %2220, %v2340_v54  }
 0x3e4   :  { %1196 = vperm.xlu0 %2221, %v2342_v45  }
 0x3e6   :  { %1181 = vperm.xlu1 %2220, %v2344_v47  }
 0x3e8   :  { %1186 = vperm.xlu0 %2221, %v2346_v48  }
 0x3ea   :  { %1491 = vperm.xlu1 %2220, %v2348_v52  }
 0x3ec   :  { %1496 = vperm.xlu0 %2221, %v2350_v1  }
 0x3ee   :  { %1501 = vperm.xlu1 %2220, %v2352_v3  }
 0x3f0   :  { %1506 = vperm.xlu0 %2221, %v2354_v41  }
 0x40f   :  { %v417_v12 = vpop.permute.xlu1 %416 }
 0x410   :  { %v407_v24 = vpop.permute.xlu0 %406  ;;  %v426_v52 = vmul.f32 %v2993_v46, %v417_v12 }
 0x411   :  { %v424_v10 = vmul.f32 %v407_v24, %v2996_v2 }
 0x414   :  { %v422_v21 = vpop.permute.xlu0 %421 }
 0x415   :  { %v427_v45 = vmul.f32 %v2999_v25, %v422_v21 }
 0x433   :  { %v1037_v8 = vpop.permute.xlu1 %1036 }
 0x435   :  { %v1042_v31 = vpop.permute.xlu0 %1041 }
 0x437   :  { %v1027_v29 = vpop.permute.xlu1 %1026 }
 0x439   :  { %v1032_v19 = vpop.permute.xlu0 %1031 }
 0x43b   :  { %v412_v54 = vpop.permute.xlu1 %411 }
 0x43c   :  { %v425_v25 = vmul.f32 %v412_v54, %v3001_v4 }
 0x43d   :  { %v577_v26 = vpop.permute.xlu0 %576 }
 0x43e   :  { %v582_v47 = vmul.f32 %v3008_v9, %v577_v26 }
 0x43f   :  { %v572_v48 = vpop.permute.xlu1 %571 }
 0x440   :  { %v1517_v1 = vsel %vm1513_vm9, %v427_v45, %v582_v47  ;;  %v581_v3 = vmul.f32 %v3004_v62, %v572_v48  ;;  %v1046_v47 = vmul.f32 %v3028_v20, %v1037_v8 }
 0x442   :  { %v1516_v41 = vsel %vm1513_vm9, %v426_v52, %v581_v3  ;;  %v1047_v52 = vmul.f32 %v3033_v5, %v1042_v31 }
 0x445   :  { %v1347_v55 = vpop.permute.xlu1 %1346 }
 0x447   :  { %v1352_v36 = vpop.permute.xlu0 %1351 }
 0x449   :  { %v562_v0 = vpop.permute.xlu1 %561 }
 0x44a   :  { %v579_v37 = vmul.f32 %v562_v0, %v3006_v14 }
 0x44b   :  { %v567_v32 = vpop.permute.xlu0 %566 }
 0x44c   :  { %v1514_v9 = vsel %vm1513_vm9, %v424_v10, %v579_v37  ;;  %v580_v46 = vmul.f32 %v567_v32, %v3010_v38 }
 0x44d   :  { %v1337_v30 = vpop.permute.xlu1 %1336 }
 0x44e   :  { %v1515_v40 = vsel %vm1513_vm9, %v425_v25, %v580_v46 }
 0x44f   :  { %v1342_v62 = vpop.permute.xlu0 %1341 }
 0x451   :  { %v727_v22 = vpop.permute.xlu1 %726 }
 0x452   :  { %v736_v53 = vmul.f32 %v3012_v42, %v727_v22 }
 0x453   :  { %v732_v58 = vpop.permute.xlu0 %731 }
 0x454   :  { %v1521_v18 = vsel %vm1518_vm10, %v1516_v41, %v736_v53  ;;  %v737_v2 = vmul.f32 %v3016_v61, %v732_v58  ;;  %v1044_v41 = vmul.f32 %v1027_v29, %v3031_v63 }
 0x455   :  { %v717_v14 = vpop.permute.xlu1 %716 }
 0x456   :  { %v1522_v24 = vsel %vm1518_vm10, %v1517_v1, %v737_v2  ;;  %v734_v4 = vmul.f32 %v717_v14, %v3014_v60 }
 0x457   :  { %v722_v12 = vpop.permute.xlu0 %721 }
 0x458   :  { %v1519_v21 = vsel %vm1518_vm10, %v1514_v9, %v734_v4  ;;  %v735_v38 = vmul.f32 %v722_v12, %v3018_v44 }
 0x459   :  { %v882_v54 = vpop.permute.xlu1 %881 }
 0x45a   :  { %v1520_v26 = vsel %vm1518_vm10, %v1515_v40, %v735_v38  ;;  %v891_v45 = vmul.f32 %v3020_v28, %v882_v54 }
 0x45b   :  { %v887_v42 = vpop.permute.xlu0 %886 }
 0x45c   :  { %v1526_v48 = vsel %vm1523_vm11, %v1521_v18, %v891_v45  ;;  %v892_v61 = vmul.f32 %v3024_v43, %v887_v42  ;;  %v1045_v43 = vmul.f32 %v1032_v19, %v3037_v59  ;;  %v1357_v59 = vmul.f32 %v3056_v23, %v1352_v36 }
 0x45d   :  { %v872_v1 = vpop.permute.xlu1 %871  ;;  %v1530_v60 = vsel %vm340_vm4, %v1526_v48, %v1046_v47 }
 0x45e   :  { %v1527_v3 = vsel %vm1523_vm11, %v1522_v24, %v892_v61  ;;  %v889_v44 = vmul.f32 %v872_v1, %v3022_v11  ;;  %v1356_v11 = vmul.f32 %v3051_v7, %v1347_v55 }
 0x45f   :  { %v877_v0 = vpop.permute.xlu0 %876  ;;  %v1531_v28 = vsel %vm340_vm4, %v1527_v3, %v1047_v52 }
 0x460   :  { %v1524_v20 = vsel %vm1523_vm11, %v1519_v21, %v889_v44  ;;  %v890_v8 = vmul.f32 %v877_v0, %v3026_v6 }
 0x461   :  { %v1192_v5 = vpop.permute.xlu1 %1191  ;;  %v1528_v31 = vsel %vm340_vm4, %v1524_v20, %v1044_v41 }
 0x462   :  { %v1525_v10 = vsel %vm1523_vm11, %v1520_v26, %v890_v8  ;;  %v1201_v37 = vmul.f32 %v3042_v13, %v1192_v5  ;;  %v1354_v13 = vmul.f32 %v1337_v30, %v3054_v16  ;;  %v2507_v8 = vmov 126  }
 0x463   :  { %v1197_v63 = vpop.permute.xlu0 %1196  ;;  %v1529_v29 = vsel %vm340_vm4, %v1525_v10, %v1045_v43  ;;  %2222 = vset.pattern.permute.xlu0 %v2507_v8  ;;  %2223 = vset.pattern.permute.xlu1 %v2507_v8  ;;  %v1699_v43 = vsel %vm1698_vm5, 1.0, %v2498_v34 }
 0x464   :  { %v1535_v32 = vsel %vm1532_vm12, %v1530_v60, %v1201_v37  ;;  %v1202_v6 = vmul.f32 %v3047_v51, %v1197_v63  ;;  %v1355_v51 = vmul.f32 %v1342_v62, %v3060_v17 }
 0x465   :  { %v1182_v19 = vpop.permute.xlu1 %1181  ;;  %v1540_v25 = vsel %vm1537_vm13, %v1535_v32, %v1356_v11 }
 0x466   :  { %v1536_v9 = vsel %vm1532_vm12, %v1531_v28, %v1202_v6  ;;  %v1199_v46 = vmul.f32 %v1182_v19, %v3044_v35  ;;  %v1987_v35 = vld [vmem:[%s3213_s2] ss:$0 sm:$0xff]  ;;  %s2508_s2 = smov 1  }
 0x467   :  { %v1187_v40 = vpop.permute.xlu0 %1186  ;;  %v1541_v7 = vsel %vm1537_vm13, %v1536_v9, %v1357_v59 }
 0x468   :  { %v1533_v55 = vsel %vm1532_vm12, %v1528_v31, %v1199_v46  ;;  %v1200_v22 = vmul.f32 %v1187_v40, %v3049_v57 }
 0x469   :  { %v1538_v23 = vsel %vm1537_vm13, %v1533_v55, %v1354_v13  ;;  %v1492_v36 = vpop.permute.xlu1 %1491 }
 0x46a   :  { %v1534_v53 = vsel %vm1532_vm12, %v1529_v29, %v1200_v22  ;;  %v1509_v16 = vmul.f32 %v1492_v36, %v3066_v27 }
 0x46b   :  { %v1497_v30 = vpop.permute.xlu0 %1496  ;;  %v1539_v58 = vsel %vm1537_vm13, %v1534_v53, %v1355_v51 }
 0x46c   :  { %v1543_v18 = vsel %vm1542_vm14, %v1538_v23, %v1509_v16  ;;  %v1510_v57 = vmul.f32 %v1497_v30, %v3071_v50 }
 0x46d   :  { %v1553_v17 = vadd.f32 %v1987_v35, %v1543_v18  ;;  %v1502_v62 = vpop.permute.xlu1 %1501 }
 0x46e   :  { %v1544_v2 = vsel %vm1542_vm14, %v1539_v58, %v1510_v57  ;;  %v1511_v14 = vmul.f32 %v3063_v15, %v1502_v62 }
 0x46f   :  { %v1561_v24 = vmul.f32 1.442695, %v1553_v17  ;;  %v1554_v4 = vadd.f32 %v1987_v35, %v1544_v2  ;;  %v1507_v12 = vpop.permute.xlu0 %1506  ;;  %vm1557_vm15 = vcmp.gt.f32.partialorder %v1553_v17, 0.0 }
 0x470   :  { %v1545_v21 = vsel %vm1542_vm14, %v1540_v25, %v1511_v14  ;;  %v1512_v27 = vmul.f32 %v3068_v49, %v1507_v12 }
 0x471   :  { %2355 = vpow2.f32 %v1561_v24  ;;  %v1563_v38 = vmul.f32 1.442695, %v1554_v4  ;;  %v1555_v54 = vadd.f32 %v1987_v35, %v1545_v21  ;;  %vm1558_vm0 = vcmp.gt.f32.partialorder %v1554_v4, 0.0 }
 0x472   :  { %v1546_v26 = vsel %vm1542_vm14, %v1541_v7, %v1512_v27 }
 0x473   :  { %2357 = vpow2.f32 %v1563_v38  ;;  %v1565_v50 = vmul.f32 1.442695, %v1555_v54  ;;  %v1556_v45 = vadd.f32 %v1987_v35, %v1546_v26  ;;  %vm1559_vm2 = vcmp.gt.f32.partialorder %v1555_v54, 0.0 }
 0x475   :  { %2359 = vpow2.f32 %v1565_v50  ;;  %v1567_v47 = vmul.f32 1.442695, %v1556_v45  ;;  %vm1560_vm3 = vcmp.gt.f32.partialorder %v1556_v45, 0.0 }
 0x477   :  { %2361 = vpow2.f32 %v1567_v47 }
 0x47b   :  { %v2356_v42 = vpop.eup %2355 }
 0x47c   :  { %v1988_v15 = vadd.f32 -1.0, %v2356_v42 }
 0x47d   :  { %v2358_v48 = vpop.eup %2357 }
 0x47e   :  { %v1989_v61 = vadd.f32 -1.0, %v2358_v48  ;;  %v1573_v49 = vsel %vm1557_vm15, %v1553_v17, %v1988_v15 }
 0x47f   :  { %v2360_v52 = vpop.eup %2359 }
 0x480   :  { %v1990_v1 = vadd.f32 -1.0, %v2360_v52  ;;  %v1574_v60 = vsel %vm1558_vm0, %v1554_v4, %v1989_v61 }
 0x481   :  { %v2362_v3 = vpop.eup %2361  ;;  %v1577_v44 = vpack.c.bf16 %v1574_v60, %v1573_v49 }
 0x482   :  { %v1991_v41 = vadd.f32 -1.0, %v2362_v3  ;;  %v1575_v0 = vsel %vm1559_vm2, %v1555_v54, %v1990_v1 }
 0x483   :  { %2141 = vmatprep.mubr.msk.bf16.mxu0 %vm1579_vm1, %v1577_v44 }
 0x484   :  { %v1576_v28 = vsel %vm1560_vm3, %v1556_v45, %v1991_v41 }
 0x485   :  { %v1578_v20 = vpack.c.bf16 %v1576_v28, %v1575_v0 }
 0x487   :  { %2142 = vmatmul.mubr.msk.bf16.vlgmr.msra.gmra.mrb[12].mxu0 %vm1579_vm1, %v1578_v20 }
 0x55a   :  { %v2143_v5 = vpop.f32.mrb[12].mxu0 }
 0x55b   :  { %v1620_v31 = vpop.f32.mrb[13].mxu0  ;;  %v1686_v10 = vsel %vm1683_vm6, %v2143_v5, -inf  ;;  %v1702_v11 = vsel %vm1697_vm7, %v2143_v5, %v1699_v43 }
 0x55c   :  { %1639 = vrot.lane.b32.xlu0 %v1620_v31, %s2508_s2  ;;  %v2144_v37 = vpop.f32.mrb[14].mxu0  ;;  %v1684_v32 = vsel %vm1683_vm6, %v1620_v31, -inf  ;;  %v1700_v6 = vsel %vm1697_vm7, %v1620_v31, %v1699_v43 }
 0x55d   :  { %v1687_v63 = vsel %vm1683_vm6, %v2144_v37, -inf  ;;  %v1623_v29 = vpop.f32.mrb[15].mxu0  ;;  %v1703_v34 = vsel %vm1697_vm7, %v2144_v37, %v1699_v43 }
 0x55e   :  { %v1689_v59 = vmax.f32 %v1686_v10, %v1687_v63  ;;  %v1685_v19 = vsel %vm1683_vm6, %v1623_v29, -inf  ;;  %v1701_v25 = vsel %vm1697_vm7, %v1623_v29, %v1699_v43  ;;  %v1705_v9 = vpack.c.bf16 %v1703_v34, %v1702_v11 }
 0x55f   :  { %v1688_v46 = vmax.f32 %v1684_v32, %v1685_v19  ;;  %v1704_v13 = vpack.c.bf16 %v1701_v25, %v1700_v6  ;;  %v2395_v25 = vld [vmem:[%s3216_s5] sm:$0xff]  }
 0x560   :  { %1643 = vrot.lane.b32.xlu0 %v2143_v5, %s2508_s2 }
 0x561   :  { %v1690_v40 = vmax.f32 %v1688_v46, %v1689_v59  ;;  %2145 = vmatprep.subr.bf16.mxu1 %v1704_v13 }
 0x562   :  { %2146 = vmatpush3.bf16.msra.mxu1 %v1704_v13  ;;  %v2396_v13 = vld [vmem:[%s3216_s5 + $0x8] sm:$0xff]  }
 0x563   :  { %2147 = vmatprep.subr.bf16.mxu1 %v1705_v9  ;;  %v1691_v7 = vrot.slane %v1690_v40, 4 }
 0x564   :  { %1727 = vperm.xlu0 %2222, %v1620_v31  }
 0x565   :  { %v1692_v55 = vmax.f32 %v1690_v40, %v1691_v7  ;;  %v2510_v7 = vmov 4  }
 0x566   :  { %2148 = vmatpush3.bf16.msra.mxu1 %v1705_v9 }
 0x567   :  { %v1693_v22 = vrot.slane %v1692_v55, 2 }
 0x568   :  { %1739 = vperm.xlu0 %2222, %v2144_v37  }
 0x569   :  { %v1694_v51 = vmax.f32 %v1692_v55, %v1693_v22 }
 0x56b   :  { %v1695_v23 = vrot.slane %v1694_v51, 1 }
 0x56d   :  { %v1696_v36 = vmax.f32 %v1694_v51, %v1695_v23 }
 0x56f   :  { %1707 = vrot.lane.b32.xlu1 %v1696_v36, %s2509_s18 }
 0x573   :  { %1641 = vrot.lane.b32.xlu1 %v1623_v29, %s2508_s2 }
 0x577   :  { %1645 = vrot.lane.b32.xlu1 %v2144_v37, %s2508_s2 }
 0x57b   :  { %1731 = vperm.xlu1 %2223, %v1623_v29  }
 0x57f   :  { %1735 = vperm.xlu1 %2223, %v2143_v5  }
 0x5ce   :  { %v1640_v12 = vpop.permute.xlu0 %1639 }
 0x5d2   :  { %v1644_v27 = vpop.permute.xlu0 %1643 }
 0x5e1   :  { %v1708_v53 = vpop.permute.xlu1 %1707 }
 0x5e2   :  { %v1710_v35 = vadd.f32 %v1708_v53, %v1620_v31  ;;  %v1711_v16 = vadd.f32 %v1708_v53, %v1623_v29  ;;  %v1712_v30 = vadd.f32 %v2143_v5, %v1708_v53  ;;  %v1713_v58 = vadd.f32 %v2144_v37, %v1708_v53 }
 0x5e3   :  { %v1728_v45 = vpop.permute.xlu0 %1727 }
 0x5e4   :  { %vm1715_vm8 = vcmp.gt.f32.partialorder %v1711_v16, 0.0  ;;  %v1719_v18 = vmul.f32 0.2, %v1711_v16  ;;  %vm1714_vm9 = vcmp.gt.f32.partialorder %v1710_v35, 0.0  ;;  %v1718_v57 = vmul.f32 0.2, %v1710_v35 }
 0x5e5   :  { %v1721_v2 = vmul.f32 0.2, %v1713_v58  ;;  %v1720_v14 = vmul.f32 0.2, %v1712_v30  ;;  %vm1717_vm10 = vcmp.gt.f32.partialorder %v1713_v58, 0.0  ;;  %vm1716_vm11 = vcmp.gt.f32.partialorder %v1712_v30, 0.0  ;;  %v1642_v21 = vpop.permute.xlu1 %1641 }
 0x5e6   :  { %v1723_v17 = vsel %vm1715_vm8, %v1711_v16, %v1719_v18  ;;  %v1722_v62 = vsel %vm1714_vm9, %v1710_v35, %v1718_v57 }
 0x5e7   :  { %1769 = vperm.xlu0 %2222, %v1723_v17   ;;  %1764 = vperm.xlu1 %2223, %v1722_v62   ;;  %v1725_v24 = vsel %vm1717_vm10, %v1713_v58, %v1721_v2  ;;  %v1724_v4 = vsel %vm1716_vm11, %v1712_v30, %v1720_v14  ;;  %v1740_v42 = vpop.permute.xlu0 %1739  ;;  %v1996_v17 = vld [vmem:[%s3215_s4] ss:$0 sm:$0xff]  ;;  %s2511_s4 = smov [#allocation8]  }
 0x5e8   :  { %s1956_s23 = sshll.u32 %s2511_s4, 4  ;;  %s1957_s23 = int_to_ptr.vmem [resolvable:$true] %s1956_s23 }
 0x5e9   :  { %v1646_v38 = vpop.permute.xlu1 %1645  ;;  %s2463_s25 = scalar_lea.vmem %s1957_s23, 512  ;;  %p2468_p11 = scmp.lt.s32.totalorder %s1957_s23, %s1957_s23 }
 0x5ea   :  { %p2464_p10 = scmp.ne.s32.totalorder %s1957_s23, %s2463_s25  ;;  %p2469_p12 = scmp.lt.s32.totalorder %s2463_s25, %s2463_s25 }
 0x5eb   :  { %1779 = vperm.xlu0 %2222, %v1725_v24   ;;  %1774 = vperm.xlu1 %2223, %v1724_v4  }
 0x5ec   :  { %p2470_p13 = por %p2469_p12, %p2468_p11 }
 0x5ee   :  { %p2471_p0 = pnand %p2470_p13, %p2464_p10 }
 0x5ef   :  { %2224 = vset.pattern.permute.xlu0 %v2510_v7 }
 0x5fa   :  { %v1732_v54 = vpop.permute.xlu1 %1731 }
 0x5fe   :  { %v1736_v26 = vpop.permute.xlu1 %1735 }
 0x614   :  { %1651 = vxpose.xlu1.b32.start [1/4] (short) (narrow) %v1640_v12, 8 }
 0x618   :  { %1652 = vxpose.xlu1.b32.cont [2/4] (short) (narrow) %v1642_v21, 8 }
 0x61c   :  { %1653 = vxpose.xlu1.b32.cont [3/4] (short) (narrow) %v1644_v27, 8 }
 0x620   :  { %1654 = vxpose.xlu1.b32.end [4/4] (short) (narrow) %v1646_v38, 8 }
 0x666   :  { %v1765_v50 = vpop.permute.xlu1 %1764  ;;  %v1770_v61 = vpop.permute.xlu0 %1769 }
 0x66a   :  { %v1775_v47 = vpop.permute.xlu1 %1774  ;;  %v1780_v43 = vpop.permute.xlu0 %1779 }
 0x694   :  { %v1667_v15 = vpop.trf.xlu1 }
 0x695   :  { %v1745_v48 = vrot.slane %v1667_v15, %v274_v56 }
 0x697   :  { %v1746_v52 = vadd.f32 %v1745_v48, %v1728_v45  ;;  %v1747_v1 = vadd.f32 %v1745_v48, %v1732_v54  ;;  %v1748_v49 = vadd.f32 %v1745_v48, %v1736_v26  ;;  %v1749_v60 = vadd.f32 %v1745_v48, %v1740_v42 }
 0x699   :  { %vm1750_vm12 = vcmp.gt.f32.partialorder %v1746_v52, 0.0  ;;  %vm1751_vm13 = vcmp.gt.f32.partialorder %v1747_v1, 0.0  ;;  %vm1752_vm14 = vcmp.gt.f32.partialorder %v1748_v49, 0.0  ;;  %vm1753_vm15 = vcmp.gt.f32.partialorder %v1749_v60, 0.0 }
 0x69a   :  { %v1754_v3 = vmul.f32 0.2, %v1746_v52  ;;  %v1755_v44 = vmul.f32 0.2, %v1747_v1  ;;  %v1756_v41 = vmul.f32 0.2, %v1748_v49 }
 0x69b   :  { %v1757_v0 = vmul.f32 0.2, %v1749_v60 }
 0x69c   :  { %v1758_v28 = vsel %vm1750_vm12, %v1746_v52, %v1754_v3  ;;  %v1759_v20 = vsel %vm1751_vm13, %v1747_v1, %v1755_v44  ;;  %v1760_v8 = vsel %vm1752_vm14, %v1748_v49, %v1756_v41 }
 0x69d   :  { %v1761_v5 = vsel %vm1753_vm15, %v1749_v60, %v1757_v0  ;;  %v1782_v39 = vsub.f32 %v1758_v28, %v1765_v50  ;;  %v1783_v56 = vsub.f32 %v1759_v20, %v1770_v61  ;;  %v1784_v31 = vsub.f32 %v1760_v8, %v1775_v47 }
 0x69e   :  { %v1785_v10 = vsub.f32 %v1761_v5, %v1780_v43 }
 0x69f   :  { %v1786_v37 = vmul.f32 1.442695, %v1782_v39  ;;  %v1788_v11 = vmul.f32 1.442695, %v1783_v56  ;;  %v1790_v63 = vmul.f32 1.442695, %v1784_v31 }
 0x6a0   :  { %v1792_v29 = vmul.f32 1.442695, %v1785_v10 }
 0x6a1   :  { %2363 = vpow2.f32 %v1786_v37 }
 0x6a2   :  { %2365 = vpow2.f32 %v1788_v11 }
 0x6a3   :  { %2367 = vpow2.f32 %v1790_v63 }
 0x6a4   :  { %2369 = vpow2.f32 %v1792_v29 }
 0x6ab   :  { %v2364_v32 = vpop.eup %2363 }
 0x6ac   :  { %v2366_v6 = vpop.eup %2365 }
 0x6ad   :  { %v2368_v34 = vpop.eup %2367  ;;  %v1794_v59 = vpack.c.bf16 %v2366_v6, %v2364_v32 }
 0x6ae   :  { %v2370_v19 = vpop.eup %2369 }
 0x6af   :  { %v1796_v9 = vmul.bf16 %v2395_v25, %v1794_v59  ;;  %v1795_v46 = vpack.c.bf16 %v2370_v19, %v2368_v34 }
 0x6b1   :  { %2149 = vmatprep.mubr.msk.bf16.mxu1 %vm340_vm4, %v1796_v9  ;;  %v1797_v40 = vmul.bf16 %v2396_v13, %v1795_v46 }
 0x6b3   :  { %2150 = vmatmul.mubr.msk.bf16.vlgmr.msra.gmra.mrb[24].mxu1 %vm340_vm4, %v1797_v40 }
 0x786   :  { %v2151_v55 = vpop.f32.mrb[24].mxu1 }
 0x787   :  { %v1855_v22 = vmax.f32 %v2151_v55, 1e-12  ;;  %v1838_v51 = vpop.f32.mrb[25].mxu1 }
 0x788   :  { %v2152_v23 = vpop.f32.mrb[26].mxu1  ;;  %v1853_v36 = vmax.f32 %v1838_v51, 1e-12 }
 0x789   :  { %2371 = vrcp.f32 %v1855_v22  ;;  %v1841_v53 = vpop.f32.mrb[27].mxu1  ;;  %v1856_v16 = vmax.f32 %v2152_v23, 1e-12 }
 0x78a   :  { %2373 = vrcp.f32 %v1853_v36  ;;  %v1854_v35 = vmax.f32 %v1841_v53, 1e-12 }
 0x78c   :  { %2375 = vrcp.f32 %v1854_v35 }
 0x78d   :  { %2377 = vrcp.f32 %v1856_v16 }
 0x793   :  { %v2372_v30 = vpop.eup %2371 }
 0x794   :  { %1873 = vperm.xlu0 %2224, %v2372_v30   ;;  %v2374_v58 = vpop.eup %2373 }
 0x796   :  { %v2376_v18 = vpop.eup %2375 }
 0x797   :  { %v2378_v57 = vpop.eup %2377 }
 0x798   :  { %1863 = vperm.xlu0 %2224, %v2374_v58  }
 0x79c   :  { %1868 = vperm.xlu0 %2224, %v2376_v18  }
 0x7a0   :  { %1878 = vperm.xlu0 %2224, %v2378_v57  }
 0x813   :  { %v1874_v62 = vpop.permute.xlu0 %1873 }
 0x814   :  { %v1883_v2 = vmul.f32 %v2151_v55, %v1874_v62 }
 0x816   :  { %v1893_v14 = vadd.f32 %v1996_v17, %v1883_v2 }
 0x817   :  { %v1864_v24 = vpop.permute.xlu0 %1863 }
 0x818   :  { %v1881_v4 = vmul.f32 %v1864_v24, %v1838_v51  ;;  %v1897_v12 = vsel %vm1697_vm7, %v1893_v14, -1e+30 }
 0x819   :  { %1903 = vmax.xlane.f32.xlu1 %v1897_v12 }
 0x81a   :  { %v1891_v21 = vadd.f32 %v1996_v17, %v1881_v4 }
 0x81b   :  { %v1869_v27 = vpop.permute.xlu0 %1868 }
 0x81c   :  { %v1882_v38 = vmul.f32 %v1869_v27, %v1841_v53  ;;  %v1895_v54 = vsel %vm1697_vm7, %v1891_v21, -1e+30 }
 0x81d   :  { %1899 = vmax.xlane.f32.xlu0 %v1895_v54 }
 0x81e   :  { %v1892_v26 = vadd.f32 %v1996_v17, %v1882_v38 }
 0x81f   :  { %v1879_v50 = vpop.permute.xlu0 %1878 }
 0x820   :  { %v1884_v45 = vmul.f32 %v2152_v23, %v1879_v50  ;;  %v1896_v47 = vsel %vm1697_vm7, %v1892_v26, -1e+30 }
 0x821   :  { %1901 = vmax.xlane.f32.xlu0 %v1896_v47 }
 0x822   :  { %v1894_v42 = vadd.f32 %v1996_v17, %v1884_v45 }
 0x824   :  { %v1898_v15 = vsel %vm1697_vm7, %v1894_v42, -1e+30 }
 0x825   :  { %1905 = vmax.xlane.f32.xlu0 %v1898_v15 }
 0x8a6   :  { %v1904_v48 = vpop.xlane.xlu1 %1903 }
 0x8a7   :  { %v1909_v61 = vsub.f32 %v1897_v12, %v1904_v48 }
 0x8a9   :  { %v1915_v52 = vmul.f32 1.442695, %v1909_v61 }
 0x8aa   :  { %v1900_v1 = vpop.xlane.xlu0 %1899 }
 0x8ab   :  { %2379 = vpow2.f32 %v1915_v52  ;;  %v1907_v49 = vsub.f32 %v1895_v54, %v1900_v1 }
 0x8ad   :  { %v1911_v60 = vmul.f32 1.442695, %v1907_v49 }
 0x8ae   :  { %v1902_v3 = vpop.xlane.xlu0 %1901 }
 0x8af   :  { %2381 = vpow2.f32 %v1911_v60  ;;  %v1908_v44 = vsub.f32 %v1896_v47, %v1902_v3 }
 0x8b1   :  { %v1913_v41 = vmul.f32 1.442695, %v1908_v44 }
 0x8b2   :  { %v1906_v0 = vpop.xlane.xlu0 %1905 }
 0x8b3   :  { %2383 = vpow2.f32 %v1913_v41  ;;  %v1910_v28 = vsub.f32 %v1898_v15, %v1906_v0 }
 0x8b5   :  { %v2380_v20 = vpop.eup %2379  ;;  %v1917_v8 = vmul.f32 1.442695, %v1910_v28 }
 0x8b6   :  { %1923 = vadd.xlane.f32.xlu0 %v2380_v20 }
 0x8b7   :  { %2385 = vpow2.f32 %v1917_v8 }
 0x8b9   :  { %v2382_v43 = vpop.eup %2381 }
 0x8ba   :  { %1919 = vadd.xlane.f32.xlu0 %v2382_v43 }
 0x8bd   :  { %v2384_v5 = vpop.eup %2383 }
 0x8be   :  { %1921 = vadd.xlane.f32.xlu0 %v2384_v5 }
 0x8c1   :  { %v2386_v39 = vpop.eup %2385 }
 0x8c2   :  { %1925 = vadd.xlane.f32.xlu0 %v2386_v39 }
 0x943   :  { %v1924_v56 = vpop.xlane.xlu0 %1923 }
 0x944   :  { %2387 = vlog2.f32 %v1924_v56 }
 0x947   :  { %v1920_v31 = vpop.xlane.xlu0 %1919 }
 0x948   :  { %2389 = vlog2.f32 %v1920_v31 }
 0x94b   :  { %v1922_v10 = vpop.xlane.xlu0 %1921 }
 0x94c   :  { %2391 = vlog2.f32 %v1922_v10 }
 0x94e   :  { %v2388_v37 = vpop.eup %2387 }
 0x94f   :  { %v1932_v11 = vmul.f32 0.6931472, %v2388_v37  ;;  %v1926_v63 = vpop.xlane.xlu0 %1925 }
 0x950   :  { %2393 = vlog2.f32 %v1926_v63 }
 0x951   :  { %v1937_v29 = vadd.f32 %v1932_v11, %v1904_v48 }
 0x952   :  { %v2390_v32 = vpop.eup %2389 }
 0x953   :  { %v1941_v6 = vsub.f32 %v1893_v14, %v1937_v29  ;;  %v1928_v34 = vmul.f32 0.6931472, %v2390_v32 }
 0x955   :  { %v1945_v59 = vsel %vm1697_vm7, %v1941_v6, 0.0  ;;  %v1935_v19 = vadd.f32 %v1928_v34, %v1900_v1 }
 0x956   :  { %v2392_v25 = vpop.eup %2391  ;;  %1949 = vst [vmem:[#allocation8 + $0x10] sm:$0xff] %v1945_v59 }
 0x957   :  { %v1939_v9 = vsub.f32 %v1891_v21, %v1935_v19  ;;  %v1930_v46 = vmul.f32 0.6931472, %v2392_v25 }
 0x959   :  { %v1943_v13 = vsel %vm1697_vm7, %v1939_v9, 0.0  ;;  %v1936_v40 = vadd.f32 %v1930_v46, %v1902_v3 }
 0x95a   :  { %v2394_v7 = vpop.eup %2393  ;;  %1947 = vst [vmem:[#allocation8] sm:$0xff] %v1943_v13 }
 0x95b   :  { %v1940_v55 = vsub.f32 %v1892_v26, %v1936_v40  ;;  %v1934_v22 = vmul.f32 0.6931472, %v2394_v7 }
 0x95d   :  { %v1944_v51 = vsel %vm1697_vm7, %v1940_v55, 0.0  ;;  %v1938_v23 = vadd.f32 %v1934_v22, %v1906_v0 }
 0x95e   :  { %1948 = vst [vmem:[#allocation8 + $0x8] sm:$0xff] %v1944_v51 }
 0x95f   :  { %v1942_v36 = vsub.f32 %v1894_v42, %v1938_v23 }
 0x961   :  { %v1946_v53 = vsel %vm1697_vm7, %v1942_v36, 0.0 }
 0x962   :  { %1950 = vst [vmem:[#allocation8 + $0x18] sm:$0xff] %v1946_v53 }
 0x963   :  { %2474 = shalt.err (!%p2471_p0)
}
 0x964   :  { %s2475_s28 = scalar_lea.hbm %s3217_s6, 512 }
 0x965   :  { %p2476_p1 = scmp.ne.s32.totalorder %s3217_s6, %s2475_s28  ;;  %p2479_p2 = scmp.lt.u32.totalorder %s2475_s28, %s3217_s6 }
 0x967   :  { %p2481_p3 = pnand %p2479_p2, %p2476_p1 }
 0x969   :  { %2484 = shalt.err (!%p2481_p3)
}
 0x96a   :  { %1962 = dma.vmem_to_hbm [thread:$0]  %s1957_s23, 512, %s3217_s6, [#allocation4], %s2493_s9, %s2493_s9, %s2494_s10  }
 0x96b   :  { %2489 = dma.done.wait [#allocation4], 512  }
 0x96c   :  { %2490 = vsyncadd [#allocation4], 4294966784 }
 0x96d   :  { %1966 = vsyncpa [#allocation3], 1 }
 0x96e   :  { %1967 = vsyncpa [#allocation6], 1 }
 0x96f   :  { %1968 = vsyncpa [#allocation4], 1 }

</bundles_post_ra>
